<compile_context>
chip_gen: v5e
topology: v5e:2x2
jax: 0.10.0
libtpu: 0.0.40
codegen_flags: <defaults>
</compile_context>

<pallas_src>
import numpy as np
import jax
import jax.numpy as jnp
from jax import lax
from jax.experimental import pallas as pl
from jax.experimental.pallas import tpu as pltpu

BN_EPS = 1e-5
BFP_BLOCK = 32
EXPANSION = 4


# ---------------------------------------------------------------------------
# In-kernel block-floating-point activation quantizer (BFPActivation).
# y is channel-major (C, M); shared power-of-2 exponent per channel block of
# BFP_BLOCK per spatial (lane) column.  Exact exponent via bitcast, exact 1/step.
# ---------------------------------------------------------------------------
def _bfp_step_from_amax(amax, bit):
    amax = jnp.maximum(amax, 1e-30)                               # guard all-zero blocks
    raw = pltpu.bitcast(amax, jnp.int32)
    e_b = jnp.bitwise_and(jnp.right_shift(raw, 23), 0xFF)         # biased exponent field
    step_e = e_b + (2 - bit)                                      # step = 2^(e + 2 - bit)
    step = pltpu.bitcast(jnp.left_shift(step_e, 23), jnp.float32)
    inv_step = pltpu.bitcast(jnp.left_shift(254 - step_e, 23), jnp.float32)  # exact 1/step
    return step, inv_step


def _bfp_quantize_cm(y, bit, block=BFP_BLOCK):
    C, M = y.shape
    qmax = float(2 ** (bit - 1) - 1)
    qmin = -float(2 ** (bit - 1))
    if C <= block:  # single channel block: one sublane reduction
        step, inv_step = _bfp_step_from_amax(
            jnp.max(jnp.abs(y), axis=0, keepdims=True), bit)
        return jnp.clip(jnp.round(y * inv_step), qmin, qmax) * step
    assert C % block == 0, "channel count must be a multiple of the BFP block size"
    y3 = y.reshape(C // block, block, M)               # split sublane-major axis only
    step, inv_step = _bfp_step_from_amax(
        jnp.max(jnp.abs(y3), axis=1, keepdims=True), bit)
    q = jnp.clip(jnp.round(y3 * inv_step), qmin, qmax) * step
    return q.reshape(C, M)


# ---------------------------------------------------------------------------
# The single fused bottleneck kernel (one grid step == one sample).
# ---------------------------------------------------------------------------
def _make_bottleneck_kernel(act1_bit, act2_bit, act3_bit, downsample):
    def kernel(x_ref, w1_ref, b1_ref, w2_ref, b2_ref, s_ref, w3_ref, b3_ref, *rest):
        if downsample:
            wsc_ref, o_ref = rest
        else:
            (o_ref,) = rest

        x = x_ref[...]                                 # (Cin, H*W) f32, per-sample slab
        xb = x.astype(jnp.bfloat16)
        P = w1_ref.shape[0]
        M2 = s_ref.shape[2]

        # ---- stage 1: conv1 (1x1) + bn1 + relu + BFP(act1) -------------------
        y1 = jnp.dot(w1_ref[...], xb, preferred_element_type=jnp.float32) + b1_ref[...]
        y1 = _bfp_quantize_cm(jnp.maximum(y1, 0.0), act1_bit)
        a1 = y1.astype(jnp.bfloat16)                   # BFP values are bf16-exact

        # ---- stage 2: conv2 (3x3, stride, pad=1) + bn2 + relu + BFP(act2) ----
        # in-kernel im2col: each tap's shifted/strided/zero-padded gather is an
        # exact 0/1 selection matmul; 9 taps accumulated in f32 on the MXU.
        y2 = jnp.zeros((P, M2), jnp.float32)
        for t in range(9):
            a_t = jnp.dot(a1, s_ref[t], preferred_element_type=jnp.float32)   # exact gather
            y2 = y2 + jnp.dot(w2_ref[t], a_t.astype(jnp.bfloat16),
                              preferred_element_type=jnp.float32)
        y2 = _bfp_quantize_cm(jnp.maximum(y2 + b2_ref[...], 0.0), act2_bit)
        a2 = y2.astype(jnp.bfloat16)

        # ---- stage 3: conv3 (1x1) + bn3 + shortcut + relu + BFP(act3)/Identity
        y3 = jnp.dot(w3_ref[...], a2, preferred_element_type=jnp.float32) + b3_ref[...]
        if downsample:
            # stride-s subsample of x == center-tap selection; fused shortcut 1x1 conv.
            # (its BN bias is already pre-summed into b3_ref)
            xs = jnp.dot(xb, s_ref[4], preferred_element_type=jnp.float32)
            y3 = y3 + jnp.dot(wsc_ref[...], xs.astype(jnp.bfloat16),
                              preferred_element_type=jnp.float32)
        else:
            y3 = y3 + x                                # identity residual, kept f32
        y3 = jnp.maximum(y3, 0.0)
        if act3_bit is not None:
            y3 = _bfp_quantize_cm(y3, act3_bit)
        o_ref[...] = y3.astype(o_ref.dtype)

    return kernel


# ---------------------------------------------------------------------------
# Host-side helpers: tap selection matrices, BN folding, weight packing/quantization.
# ---------------------------------------------------------------------------
def build_tap_selectors(H, W, stride):
    """0/1 matrices S[dh*3+dw] of shape (H*W, Ho*Wo):
    S[t, h*W+w, ho*Wo+wo] = 1 iff (h, w) == (stride*ho+dh-1, stride*wo+dw-1).
    Encodes the padded 3x3 im2col; the center tap (t=4) doubles as the stride-s
    1x1-shortcut subsampler."""
    Ho = (H + 2 - 3) // stride + 1
    Wo = (W + 2 - 3) // stride + 1
    S = np.zeros((9, H * W, Ho * Wo), np.float32)
    for dh in range(3):
        for dw in range(3):
            t = dh * 3 + dw
            for ho in range(Ho):
                h = stride * ho + dh - 1
                if h < 0 or h >= H:
                    continue
                for wo in range(Wo):
                    w = stride * wo + dw - 1
                    if w < 0 or w >= W:
                        continue
                    S[t, h * W + w, ho * Wo + wo] = 1.0
    return S, Ho, Wo


def fold_bn(gamma, beta, mean, var):
    scale = gamma / jnp.sqrt(var + BN_EPS)
    bias = beta - mean * scale
    return scale, bias


def _exponent_of(x):
    raw = lax.bitcast_convert_type(x.astype(jnp.float32), jnp.int32)
    return jnp.bitwise_and(jnp.right_shift(raw, 23), 0xFF) - 127


def quantize_weights_bfp(w, bit, block_size=BFP_BLOCK):
    """BFP weight quantizer (DSConv2d emulation): shared power-of-2 exponent per Cin block,
    `bit`-bit signed mantissa.  Uses the same exponent-field extraction as the activations."""
    Cin = w.shape[1]
    assert Cin <= block_size, "demo supports Cin <= block_size"
    amax = jnp.maximum(jnp.max(jnp.abs(w), axis=1, keepdims=True), 1e-30)
    step = jnp.exp2((_exponent_of(amax) + (2 - bit)).astype(jnp.float32))
    qmax = float(2 ** (bit - 1) - 1)
    qmin = -float(2 ** (bit - 1))
    return jnp.clip(jnp.round(w / step), qmin, qmax) * step


def prepare_params(w1, w2, w3, wsc, bn1, bn2, bn3, bnsc):
    """Pack conv weights for the fused kernel and fold the BatchNorm scale into them (bf16)."""
    s1, b1 = bn1; s2, b2 = bn2; s3, b3 = bn3; ssc, bsc = bnsc
    w1m = (w1.reshape(w1.shape[0], w1.shape[1]) * s1[:, None]).astype(jnp.bfloat16)
    # 3x3 weights per tap: (9, Cout, Cin), tap index = dh*3+dw
    w2t = jnp.transpose(w2, (2, 3, 0, 1)).reshape(9, w2.shape[0], w2.shape[1])
    w2t = (w2t * s2[None, :, None]).astype(jnp.bfloat16)
    w3m = (w3.reshape(w3.shape[0], w3.shape[1]) * s3[:, None]).astype(jnp.bfloat16)
    wscm = (wsc.reshape(wsc.shape[0], wsc.shape[1]) * ssc[:, None]).astype(jnp.bfloat16)
    return dict(w1m=w1m, b1=b1, w2t=w2t, b2=b2, w3m=w3m, b3=b3, wscm=wscm, bsc=bsc,
                planes=w1.shape[0], out_planes=w3.shape[0])


# ---------------------------------------------------------------------------
# QuantBottleneck forward: one pallas_call, grid over the batch.
# ---------------------------------------------------------------------------
def quant_bottleneck(x_nchw, params, *, stride, act1_bit, act2_bit, act3_bit):
    N, Cin, H, W = x_nchw.shape
    P = params["planes"]
    Cexp = params["out_planes"]
    HW = H * W
    downsample = (stride != 1) or (Cin != Cexp)

    S_np, Ho, Wo = build_tap_selectors(H, W, stride)
    M2 = Ho * Wo
    S = jnp.asarray(S_np, jnp.bfloat16)                  # 0/1 values: exact in bf16

    x = x_nchw.reshape(N, Cin, HW)                       # free view; per-sample slab is channel-major
    b1 = params["b1"].reshape(P, 1).astype(jnp.float32)
    b2 = params["b2"].reshape(P, 1).astype(jnp.float32)
    b3 = params["b3"] + params["bsc"] if downsample else params["b3"]
    b3 = b3.reshape(Cexp, 1).astype(jnp.float32)

    args = [x, params["w1m"], b1, params["w2t"], b2, S, params["w3m"], b3]
    in_specs = [
        pl.BlockSpec((pl.Squeezed(), Cin, HW), lambda n: (n, 0, 0)),     # per-sample input slab
        pl.BlockSpec((P, Cin), lambda n: (0, 0)),                        # conv1 weight (bn-folded)
        pl.BlockSpec((P, 1), lambda n: (0, 0)),                          # bn1 bias
        pl.BlockSpec((9, P, P), lambda n: (0, 0, 0)),                    # conv2 per-tap weights
        pl.BlockSpec((P, 1), lambda n: (0, 0)),                          # bn2 bias
        pl.BlockSpec((9, HW, M2), lambda n: (0, 0, 0)),                  # tap selection matrices
        pl.BlockSpec((Cexp, P), lambda n: (0, 0)),                       # conv3 weight
        pl.BlockSpec((Cexp, 1), lambda n: (0, 0)),                       # bn3 (+bnsc) bias
    ]
    if downsample:
        args.append(params["wscm"])
        in_specs.append(pl.BlockSpec((Cexp, Cin), lambda n: (0, 0)))     # shortcut conv weight

    flops = N * (2 * Cin * P * HW
                 + 9 * (2 * P * HW * M2 + 2 * P * P * M2)
                 + 2 * P * Cexp * M2
                 + (2 * Cin * HW * M2 + 2 * Cin * Cexp * M2 if downsample else 0))
    bytes_accessed = (x.size * 4 + S.size * 2 + params["w2t"].size * 2
                      + params["w1m"].size * 2 + params["w3m"].size * 2
                      + (params["wscm"].size * 2 if downsample else 0)
                      + (2 * P + Cexp) * 4 + N * Cexp * M2 * 4)

    out = pl.pallas_call(
        _make_bottleneck_kernel(act1_bit, act2_bit, act3_bit, downsample),
        out_shape=jax.ShapeDtypeStruct((N, Cexp, M2), jnp.float32),
        grid=(N,),
        in_specs=in_specs,
        out_specs=pl.BlockSpec((pl.Squeezed(), Cexp, M2), lambda n: (n, 0, 0)),
        compiler_params=pltpu.CompilerParams(dimension_semantics=("parallel",)),
        cost_estimate=pl.CostEstimate(flops=int(flops), transcendentals=0,
                                      bytes_accessed=int(bytes_accessed)),
    )(*args)
    return out.reshape(N, Cexp, Ho, Wo)                  # free view back to NCHW


# ---------------------------------------------------------------------------
# Independent plain-XLA reference (same folded weights / quantizers) for validation.
# ---------------------------------------------------------------------------
def _bfp_quantize_ref(y, bit, block=BFP_BLOCK):
    assert y.shape[1] <= block
    amax = jnp.maximum(jnp.max(jnp.abs(y), axis=1, keepdims=True), 1e-30)
    step = jnp.exp2((_exponent_of(amax) + (2 - bit)).astype(jnp.float32))
    qmax = float(2 ** (bit - 1) - 1)
    qmin = -float(2 ** (bit - 1))
    return jnp.clip(jnp.round(y / step), qmin, qmax) * step


def reference_forward(x, params, *, stride, act1_bit, act2_bit, act3_bit):
    N, Cin, H, W = x.shape
    P = params["planes"]; Cexp = params["out_planes"]
    downsample = (stride != 1) or (Cin != Cexp)
    w1 = params["w1m"].astype(jnp.float32).reshape(P, Cin, 1, 1)
    w2 = jnp.transpose(params["w2t"].astype(jnp.float32).reshape(3, 3, P, P), (2, 3, 0, 1))
    w3 = params["w3m"].astype(jnp.float32).reshape(Cexp, P, 1, 1)
    wsc = params["wscm"].astype(jnp.float32).reshape(Cexp, Cin, 1, 1)

    def conv(a, w, s, p):
        return lax.conv_general_dilated(a.astype(jnp.bfloat16).astype(jnp.float32), w,
                                        (s, s), [(p, p), (p, p)],
                                        dimension_numbers=("NCHW", "OIHW", "NCHW"))

    y = conv(x, w1, 1, 0) + params["b1"][None, :, None, None]
    y = _bfp_quantize_ref(jnp.maximum(y, 0.0), act1_bit)
    y = conv(y, w2, stride, 1) + params["b2"][None, :, None, None]
    y = _bfp_quantize_ref(jnp.maximum(y, 0.0), act2_bit)
    y = conv(y, w3, 1, 0) + params["b3"][None, :, None, None]
    if downsample:
        y = y + conv(x, wsc, stride, 0) + params["bsc"][None, :, None, None]
    else:
        y = y + x
    y = jnp.maximum(y, 0.0)
    if act3_bit is not None:
        y = _bfp_quantize_ref(y, act3_bit)
    return y


# ---------------------------------------------------------------------------
if __name__ == "__main__":
    key = jax.random.PRNGKey(0)
    ks = jax.random.split(key, 12)

    N, in_planes, H, W = 2, 4, 16, 16
    planes, stride = 8, 2
    out_planes = EXPANSION * planes                    # 32

    # replicate QuantBottleneck.__init__'s bits.pop() bookkeeping (the list is mutated)
    bits = [8, 6, 4, 4, 4, 4]
    first_bit = bits.pop(0)                            # conv1 / shortcut conv weight bits
    act1_bit = bits[0]                                 # BFPActivation after bn1
    conv2_bit = bits.pop(0)                            # conv2 weight bits
    act2_bit = bits[0]                                 # BFPActivation after bn2
    conv3_bit = bits.pop(0)                            # conv3 weight bits
    act3_bit = bits[0] if len(bits) > 1 else None      # BFPActivation after residual (else Identity)

    x_nchw = jax.random.normal(ks[0], (N, in_planes, H, W), jnp.float32)

    # deterministic parameter init + DSConv2d-style weight quantization
    w1 = quantize_weights_bfp(
        0.3 * jax.random.normal(ks[1], (planes, in_planes, 1, 1), jnp.float32), first_bit)
    w2 = quantize_weights_bfp(
        0.3 * jax.random.normal(ks[2], (planes, planes, 3, 3), jnp.float32), conv2_bit)
    w3 = quantize_weights_bfp(
        0.3 * jax.random.normal(ks[3], (out_planes, planes, 1, 1), jnp.float32), conv3_bit)
    wsc = quantize_weights_bfp(
        0.3 * jax.random.normal(ks[4], (out_planes, in_planes, 1, 1), jnp.float32), first_bit)

    def make_bn(k, C):
        a, b, c, d = jax.random.split(k, 4)
        gamma = 1.0 + 0.1 * jax.random.normal(a, (C,), jnp.float32)
        beta = 0.1 * jax.random.normal(b, (C,), jnp.float32)
        mean = 0.05 * jax.random.normal(c, (C,), jnp.float32)
        var = 1.0 + 0.1 * jax.random.uniform(d, (C,), jnp.float32)
        return fold_bn(gamma, beta, mean, var)

    params = prepare_params(w1, w2, w3, wsc,
                            make_bn(ks[5], planes), make_bn(ks[6], planes),
                            make_bn(ks[7], out_planes), make_bn(ks[8], out_planes))

    out = quant_bottleneck(x_nchw, params, stride=stride,
                           act1_bit=act1_bit, act2_bit=act2_bit, act3_bit=act3_bit)
    out = jax.block_until_ready(out)

    Ho = (H + 2 - 3) // stride + 1
    assert out.shape == (N, out_planes, Ho, Ho), out.shape
    assert bool(jnp.all(jnp.isfinite(out)))

    # validate against an independent XLA reference (loose Frobenius-relative check: robust to
    # isolated quantization-boundary flips caused by f32 accumulation-order differences)
    ref = reference_forward(x_nchw, params, stride=stride, act1_bit=act1_bit,
                            act2_bit=act2_bit, act3_bit=act3_bit)
    rel_err = float(jnp.linalg.norm(out - ref) / (jnp.linalg.norm(ref) + 1e-6))
    assert rel_err < 5e-2, rel_err

    print("KERNEL_OK")
</pallas_src>

<mosaic_0001>
module attributes {stable_mosaic.version = 11 : i64} {
  func.func @kernel(%arg0: i32, %arg1: memref<1x4x256xf32, #tpu.memory_space<vmem>>, %arg2: memref<8x4xbf16, #tpu.memory_space<vmem>>, %arg3: memref<8x1xf32, #tpu.memory_space<vmem>>, %arg4: memref<9x8x8xbf16, #tpu.memory_space<vmem>>, %arg5: memref<8x1xf32, #tpu.memory_space<vmem>>, %arg6: memref<9x256x64xbf16, #tpu.memory_space<vmem>>, %arg7: memref<32x8xbf16, #tpu.memory_space<vmem>>, %arg8: memref<32x1xf32, #tpu.memory_space<vmem>>, %arg9: memref<32x4xbf16, #tpu.memory_space<vmem>>, %arg10: memref<1x32x64xf32, #tpu.memory_space<vmem>>) attributes {dimension_semantics = [#tpu.dimension_semantics<parallel>], iteration_bounds = array<i64: 2>, scalar_prefetch = 0 : i64, scratch_operands = 0 : i64, tpu.core_type = #tpu.core_type<tc>, window_params = [{transform_indices = @transform_0, window_bounds = array<i64: 1, 4, 256>}, {pipeline_mode = #tpu.pipeline_mode<synchronous>, transform_indices = @transform_1, window_bounds = array<i64: 8, 4>}, {pipeline_mode = #tpu.pipeline_mode<synchronous>, transform_indices = @transform_2, window_bounds = array<i64: 8, 1>}, {pipeline_mode = #tpu.pipeline_mode<synchronous>, transform_indices = @transform_3, window_bounds = array<i64: 9, 8, 8>}, {pipeline_mode = #tpu.pipeline_mode<synchronous>, transform_indices = @transform_4, window_bounds = array<i64: 8, 1>}, {pipeline_mode = #tpu.pipeline_mode<synchronous>, transform_indices = @transform_5, window_bounds = array<i64: 9, 256, 64>}, {pipeline_mode = #tpu.pipeline_mode<synchronous>, transform_indices = @transform_6, window_bounds = array<i64: 32, 8>}, {pipeline_mode = #tpu.pipeline_mode<synchronous>, transform_indices = @transform_7, window_bounds = array<i64: 32, 1>}, {pipeline_mode = #tpu.pipeline_mode<synchronous>, transform_indices = @transform_8, window_bounds = array<i64: 32, 4>}, {transform_indices = @transform_9, window_bounds = array<i64: 1, 32, 64>}]} {
    %c0 = arith.constant 0 : index
    %c0_0 = arith.constant 0 : index
    %c0_1 = arith.constant 0 : index
    %0 = vector.load %arg1[%c0, %c0_0, %c0_1] : memref<1x4x256xf32, #tpu.memory_space<vmem>>, vector<1x4x256xf32>
    %1 = vector.shape_cast %0 : vector<1x4x256xf32> to vector<4x256xf32>
    %2 = arith.truncf %1 : vector<4x256xf32> to vector<4x256xbf16>
    %c0_2 = arith.constant 0 : index
    %c0_3 = arith.constant 0 : index
    %3 = vector.load %arg2[%c0_2, %c0_3] : memref<8x4xbf16, #tpu.memory_space<vmem>>, vector<8x4xbf16>
    %cst = arith.constant dense<0.000000e+00> : vector<8x256xf32>
    %4 = tpu.matmul %3, %2, %cst {dimension_numbers = #tpu.dot_dimension_numbers<[1], [0], [0], [1], [0, 0, 1, 1], [], []>} : vector<8x4xbf16>, vector<4x256xbf16>, vector<8x256xf32> -> vector<8x256xf32>
    %c0_4 = arith.constant 0 : index
    %c0_5 = arith.constant 0 : index
    %5 = vector.load %arg3[%c0_4, %c0_5] : memref<8x1xf32, #tpu.memory_space<vmem>>, vector<8x1xf32>
    %6 = vector.broadcast %5 : vector<8x1xf32> to vector<8x256xf32>
    %7 = arith.addf %4, %6 : vector<8x256xf32>
    %cst_6 = arith.constant 0.000000e+00 : f32
    %8 = vector.broadcast %cst_6 : f32 to vector<8x256xf32>
    %9 = arith.maximumf %7, %8 : vector<8x256xf32>
    %10 = math.absf %9 : vector<8x256xf32>
    %cst_7 = arith.constant dense<0xFF800000> : vector<256xf32>
    %11 = vector.multi_reduction <maximumf>, %10, %cst_7 [0] : vector<8x256xf32> to vector<256xf32>
    %12 = vector.shape_cast %11 : vector<256xf32> to vector<1x256xf32>
    %cst_8 = arith.constant 1.000000e-30 : f32
    %13 = vector.broadcast %cst_8 : f32 to vector<1x256xf32>
    %14 = arith.maximumf %12, %13 : vector<1x256xf32>
    %15 = tpu.bitcast %14 : vector<1x256xf32> -> vector<1x256xi32>
    %c23_i32 = arith.constant 23 : i32
    %16 = vector.broadcast %c23_i32 : i32 to vector<1x256xi32>
    %17 = arith.shrsi %15, %16 : vector<1x256xi32>
    %c255_i32 = arith.constant 255 : i32
    %18 = vector.broadcast %c255_i32 : i32 to vector<1x256xi32>
    %19 = arith.andi %17, %18 : vector<1x256xi32>
    %c-4_i32 = arith.constant -4 : i32
    %20 = vector.broadcast %c-4_i32 : i32 to vector<1x256xi32>
    %21 = arith.addi %19, %20 : vector<1x256xi32>
    %c23_i32_9 = arith.constant 23 : i32
    %22 = vector.broadcast %c23_i32_9 : i32 to vector<1x256xi32>
    %23 = arith.shli %21, %22 : vector<1x256xi32>
    %24 = tpu.bitcast %23 : vector<1x256xi32> -> vector<1x256xf32>
    %c254_i32 = arith.constant 254 : i32
    %25 = vector.broadcast %c254_i32 : i32 to vector<1x256xi32>
    %26 = arith.subi %25, %21 : vector<1x256xi32>
    %c23_i32_10 = arith.constant 23 : i32
    %27 = vector.broadcast %c23_i32_10 : i32 to vector<1x256xi32>
    %28 = arith.shli %26, %27 : vector<1x256xi32>
    %29 = tpu.bitcast %28 : vector<1x256xi32> -> vector<1x256xf32>
    %30 = vector.broadcast %29 : vector<1x256xf32> to vector<8x256xf32>
    %31 = arith.mulf %9, %30 : vector<8x256xf32>
    %32 = math.roundeven %31 : vector<8x256xf32>
    %cst_11 = arith.constant -3.200000e+01 : f32
    %cst_12 = arith.constant 3.100000e+01 : f32
    %33 = vector.broadcast %cst_11 : f32 to vector<8x256xf32>
    %34 = arith.maximumf %33, %32 : vector<8x256xf32>
    %35 = vector.broadcast %cst_12 : f32 to vector<8x256xf32>
    %36 = arith.minimumf %35, %34 : vector<8x256xf32>
    %37 = vector.broadcast %24 : vector<1x256xf32> to vector<8x256xf32>
    %38 = arith.mulf %36, %37 : vector<8x256xf32>
    %39 = arith.truncf %38 : vector<8x256xf32> to vector<8x256xbf16>
    %cst_13 = arith.constant 0.000000e+00 : f32
    %40 = vector.broadcast %cst_13 : f32 to vector<8x64xf32>
    %c0_14 = arith.constant 0 : index
    %c0_15 = arith.constant 0 : index
    %c0_16 = arith.constant 0 : index
    %41 = vector.load %arg6[%c0_14, %c0_15, %c0_16] : memref<9x256x64xbf16, #tpu.memory_space<vmem>>, vector<1x256x64xbf16>
    %42 = vector.shape_cast %41 : vector<1x256x64xbf16> to vector<256x64xbf16>
    %cst_17 = arith.constant dense<0.000000e+00> : vector<8x64xf32>
    %43 = tpu.matmul %39, %42, %cst_17 {dimension_numbers = #tpu.dot_dimension_numbers<[1], [0], [0], [1], [0, 0, 1, 1], [], []>} : vector<8x256xbf16>, vector<256x64xbf16>, vector<8x64xf32> -> vector<8x64xf32>
    %c0_18 = arith.constant 0 : index
    %c0_19 = arith.constant 0 : index
    %c0_20 = arith.constant 0 : index
    %44 = vector.load %arg4[%c0_18, %c0_19, %c0_20] : memref<9x8x8xbf16, #tpu.memory_space<vmem>>, vector<1x8x8xbf16>
    %45 = vector.shape_cast %44 : vector<1x8x8xbf16> to vector<8x8xbf16>
    %46 = arith.truncf %43 : vector<8x64xf32> to vector<8x64xbf16>
    %cst_21 = arith.constant dense<0.000000e+00> : vector<8x64xf32>
    %47 = tpu.matmul %45, %46, %cst_21 {dimension_numbers = #tpu.dot_dimension_numbers<[1], [0], [0], [1], [0, 0, 1, 1], [], []>} : vector<8x8xbf16>, vector<8x64xbf16>, vector<8x64xf32> -> vector<8x64xf32>
    %48 = arith.addf %40, %47 : vector<8x64xf32>
    %c1 = arith.constant 1 : index
    %c0_22 = arith.constant 0 : index
    %c0_23 = arith.constant 0 : index
    %49 = vector.load %arg6[%c1, %c0_22, %c0_23] : memref<9x256x64xbf16, #tpu.memory_space<vmem>>, vector<1x256x64xbf16>
    %50 = vector.shape_cast %49 : vector<1x256x64xbf16> to vector<256x64xbf16>
    %cst_24 = arith.constant dense<0.000000e+00> : vector<8x64xf32>
    %51 = tpu.matmul %39, %50, %cst_24 {dimension_numbers = #tpu.dot_dimension_numbers<[1], [0], [0], [1], [0, 0, 1, 1], [], []>} : vector<8x256xbf16>, vector<256x64xbf16>, vector<8x64xf32> -> vector<8x64xf32>
    %c1_25 = arith.constant 1 : index
    %c0_26 = arith.constant 0 : index
    %c0_27 = arith.constant 0 : index
    %52 = vector.load %arg4[%c1_25, %c0_26, %c0_27] : memref<9x8x8xbf16, #tpu.memory_space<vmem>>, vector<1x8x8xbf16>
    %53 = vector.shape_cast %52 : vector<1x8x8xbf16> to vector<8x8xbf16>
    %54 = arith.truncf %51 : vector<8x64xf32> to vector<8x64xbf16>
    %cst_28 = arith.constant dense<0.000000e+00> : vector<8x64xf32>
    %55 = tpu.matmul %53, %54, %cst_28 {dimension_numbers = #tpu.dot_dimension_numbers<[1], [0], [0], [1], [0, 0, 1, 1], [], []>} : vector<8x8xbf16>, vector<8x64xbf16>, vector<8x64xf32> -> vector<8x64xf32>
    %56 = arith.addf %48, %55 : vector<8x64xf32>
    %c2 = arith.constant 2 : index
    %c0_29 = arith.constant 0 : index
    %c0_30 = arith.constant 0 : index
    %57 = vector.load %arg6[%c2, %c0_29, %c0_30] : memref<9x256x64xbf16, #tpu.memory_space<vmem>>, vector<1x256x64xbf16>
    %58 = vector.shape_cast %57 : vector<1x256x64xbf16> to vector<256x64xbf16>
    %cst_31 = arith.constant dense<0.000000e+00> : vector<8x64xf32>
    %59 = tpu.matmul %39, %58, %cst_31 {dimension_numbers = #tpu.dot_dimension_numbers<[1], [0], [0], [1], [0, 0, 1, 1], [], []>} : vector<8x256xbf16>, vector<256x64xbf16>, vector<8x64xf32> -> vector<8x64xf32>
    %c2_32 = arith.constant 2 : index
    %c0_33 = arith.constant 0 : index
    %c0_34 = arith.constant 0 : index
    %60 = vector.load %arg4[%c2_32, %c0_33, %c0_34] : memref<9x8x8xbf16, #tpu.memory_space<vmem>>, vector<1x8x8xbf16>
    %61 = vector.shape_cast %60 : vector<1x8x8xbf16> to vector<8x8xbf16>
    %62 = arith.truncf %59 : vector<8x64xf32> to vector<8x64xbf16>
    %cst_35 = arith.constant dense<0.000000e+00> : vector<8x64xf32>
    %63 = tpu.matmul %61, %62, %cst_35 {dimension_numbers = #tpu.dot_dimension_numbers<[1], [0], [0], [1], [0, 0, 1, 1], [], []>} : vector<8x8xbf16>, vector<8x64xbf16>, vector<8x64xf32> -> vector<8x64xf32>
    %64 = arith.addf %56, %63 : vector<8x64xf32>
    %c3 = arith.constant 3 : index
    %c0_36 = arith.constant 0 : index
    %c0_37 = arith.constant 0 : index
    %65 = vector.load %arg6[%c3, %c0_36, %c0_37] : memref<9x256x64xbf16, #tpu.memory_space<vmem>>, vector<1x256x64xbf16>
    %66 = vector.shape_cast %65 : vector<1x256x64xbf16> to vector<256x64xbf16>
    %cst_38 = arith.constant dense<0.000000e+00> : vector<8x64xf32>
    %67 = tpu.matmul %39, %66, %cst_38 {dimension_numbers = #tpu.dot_dimension_numbers<[1], [0], [0], [1], [0, 0, 1, 1], [], []>} : vector<8x256xbf16>, vector<256x64xbf16>, vector<8x64xf32> -> vector<8x64xf32>
    %c3_39 = arith.constant 3 : index
    %c0_40 = arith.constant 0 : index
    %c0_41 = arith.constant 0 : index
    %68 = vector.load %arg4[%c3_39, %c0_40, %c0_41] : memref<9x8x8xbf16, #tpu.memory_space<vmem>>, vector<1x8x8xbf16>
    %69 = vector.shape_cast %68 : vector<1x8x8xbf16> to vector<8x8xbf16>
    %70 = arith.truncf %67 : vector<8x64xf32> to vector<8x64xbf16>
    %cst_42 = arith.constant dense<0.000000e+00> : vector<8x64xf32>
    %71 = tpu.matmul %69, %70, %cst_42 {dimension_numbers = #tpu.dot_dimension_numbers<[1], [0], [0], [1], [0, 0, 1, 1], [], []>} : vector<8x8xbf16>, vector<8x64xbf16>, vector<8x64xf32> -> vector<8x64xf32>
    %72 = arith.addf %64, %71 : vector<8x64xf32>
    %c4 = arith.constant 4 : index
    %c0_43 = arith.constant 0 : index
    %c0_44 = arith.constant 0 : index
    %73 = vector.load %arg6[%c4, %c0_43, %c0_44] : memref<9x256x64xbf16, #tpu.memory_space<vmem>>, vector<1x256x64xbf16>
    %74 = vector.shape_cast %73 : vector<1x256x64xbf16> to vector<256x64xbf16>
    %cst_45 = arith.constant dense<0.000000e+00> : vector<8x64xf32>
    %75 = tpu.matmul %39, %74, %cst_45 {dimension_numbers = #tpu.dot_dimension_numbers<[1], [0], [0], [1], [0, 0, 1, 1], [], []>} : vector<8x256xbf16>, vector<256x64xbf16>, vector<8x64xf32> -> vector<8x64xf32>
    %c4_46 = arith.constant 4 : index
    %c0_47 = arith.constant 0 : index
    %c0_48 = arith.constant 0 : index
    %76 = vector.load %arg4[%c4_46, %c0_47, %c0_48] : memref<9x8x8xbf16, #tpu.memory_space<vmem>>, vector<1x8x8xbf16>
    %77 = vector.shape_cast %76 : vector<1x8x8xbf16> to vector<8x8xbf16>
    %78 = arith.truncf %75 : vector<8x64xf32> to vector<8x64xbf16>
    %cst_49 = arith.constant dense<0.000000e+00> : vector<8x64xf32>
    %79 = tpu.matmul %77, %78, %cst_49 {dimension_numbers = #tpu.dot_dimension_numbers<[1], [0], [0], [1], [0, 0, 1, 1], [], []>} : vector<8x8xbf16>, vector<8x64xbf16>, vector<8x64xf32> -> vector<8x64xf32>
    %80 = arith.addf %72, %79 : vector<8x64xf32>
    %c5 = arith.constant 5 : index
    %c0_50 = arith.constant 0 : index
    %c0_51 = arith.constant 0 : index
    %81 = vector.load %arg6[%c5, %c0_50, %c0_51] : memref<9x256x64xbf16, #tpu.memory_space<vmem>>, vector<1x256x64xbf16>
    %82 = vector.shape_cast %81 : vector<1x256x64xbf16> to vector<256x64xbf16>
    %cst_52 = arith.constant dense<0.000000e+00> : vector<8x64xf32>
    %83 = tpu.matmul %39, %82, %cst_52 {dimension_numbers = #tpu.dot_dimension_numbers<[1], [0], [0], [1], [0, 0, 1, 1], [], []>} : vector<8x256xbf16>, vector<256x64xbf16>, vector<8x64xf32> -> vector<8x64xf32>
    %c5_53 = arith.constant 5 : index
    %c0_54 = arith.constant 0 : index
    %c0_55 = arith.constant 0 : index
    %84 = vector.load %arg4[%c5_53, %c0_54, %c0_55] : memref<9x8x8xbf16, #tpu.memory_space<vmem>>, vector<1x8x8xbf16>
    %85 = vector.shape_cast %84 : vector<1x8x8xbf16> to vector<8x8xbf16>
    %86 = arith.truncf %83 : vector<8x64xf32> to vector<8x64xbf16>
    %cst_56 = arith.constant dense<0.000000e+00> : vector<8x64xf32>
    %87 = tpu.matmul %85, %86, %cst_56 {dimension_numbers = #tpu.dot_dimension_numbers<[1], [0], [0], [1], [0, 0, 1, 1], [], []>} : vector<8x8xbf16>, vector<8x64xbf16>, vector<8x64xf32> -> vector<8x64xf32>
    %88 = arith.addf %80, %87 : vector<8x64xf32>
    %c6 = arith.constant 6 : index
    %c0_57 = arith.constant 0 : index
    %c0_58 = arith.constant 0 : index
    %89 = vector.load %arg6[%c6, %c0_57, %c0_58] : memref<9x256x64xbf16, #tpu.memory_space<vmem>>, vector<1x256x64xbf16>
    %90 = vector.shape_cast %89 : vector<1x256x64xbf16> to vector<256x64xbf16>
    %cst_59 = arith.constant dense<0.000000e+00> : vector<8x64xf32>
    %91 = tpu.matmul %39, %90, %cst_59 {dimension_numbers = #tpu.dot_dimension_numbers<[1], [0], [0], [1], [0, 0, 1, 1], [], []>} : vector<8x256xbf16>, vector<256x64xbf16>, vector<8x64xf32> -> vector<8x64xf32>
    %c6_60 = arith.constant 6 : index
    %c0_61 = arith.constant 0 : index
    %c0_62 = arith.constant 0 : index
    %92 = vector.load %arg4[%c6_60, %c0_61, %c0_62] : memref<9x8x8xbf16, #tpu.memory_space<vmem>>, vector<1x8x8xbf16>
    %93 = vector.shape_cast %92 : vector<1x8x8xbf16> to vector<8x8xbf16>
    %94 = arith.truncf %91 : vector<8x64xf32> to vector<8x64xbf16>
    %cst_63 = arith.constant dense<0.000000e+00> : vector<8x64xf32>
    %95 = tpu.matmul %93, %94, %cst_63 {dimension_numbers = #tpu.dot_dimension_numbers<[1], [0], [0], [1], [0, 0, 1, 1], [], []>} : vector<8x8xbf16>, vector<8x64xbf16>, vector<8x64xf32> -> vector<8x64xf32>
    %96 = arith.addf %88, %95 : vector<8x64xf32>
    %c7 = arith.constant 7 : index
    %c0_64 = arith.constant 0 : index
    %c0_65 = arith.constant 0 : index
    %97 = vector.load %arg6[%c7, %c0_64, %c0_65] : memref<9x256x64xbf16, #tpu.memory_space<vmem>>, vector<1x256x64xbf16>
    %98 = vector.shape_cast %97 : vector<1x256x64xbf16> to vector<256x64xbf16>
    %cst_66 = arith.constant dense<0.000000e+00> : vector<8x64xf32>
    %99 = tpu.matmul %39, %98, %cst_66 {dimension_numbers = #tpu.dot_dimension_numbers<[1], [0], [0], [1], [0, 0, 1, 1], [], []>} : vector<8x256xbf16>, vector<256x64xbf16>, vector<8x64xf32> -> vector<8x64xf32>
    %c7_67 = arith.constant 7 : index
    %c0_68 = arith.constant 0 : index
    %c0_69 = arith.constant 0 : index
    %100 = vector.load %arg4[%c7_67, %c0_68, %c0_69] : memref<9x8x8xbf16, #tpu.memory_space<vmem>>, vector<1x8x8xbf16>
    %101 = vector.shape_cast %100 : vector<1x8x8xbf16> to vector<8x8xbf16>
    %102 = arith.truncf %99 : vector<8x64xf32> to vector<8x64xbf16>
    %cst_70 = arith.constant dense<0.000000e+00> : vector<8x64xf32>
    %103 = tpu.matmul %101, %102, %cst_70 {dimension_numbers = #tpu.dot_dimension_numbers<[1], [0], [0], [1], [0, 0, 1, 1], [], []>} : vector<8x8xbf16>, vector<8x64xbf16>, vector<8x64xf32> -> vector<8x64xf32>
    %104 = arith.addf %96, %103 : vector<8x64xf32>
    %c8 = arith.constant 8 : index
    %c0_71 = arith.constant 0 : index
    %c0_72 = arith.constant 0 : index
    %105 = vector.load %arg6[%c8, %c0_71, %c0_72] : memref<9x256x64xbf16, #tpu.memory_space<vmem>>, vector<1x256x64xbf16>
    %106 = vector.shape_cast %105 : vector<1x256x64xbf16> to vector<256x64xbf16>
    %cst_73 = arith.constant dense<0.000000e+00> : vector<8x64xf32>
    %107 = tpu.matmul %39, %106, %cst_73 {dimension_numbers = #tpu.dot_dimension_numbers<[1], [0], [0], [1], [0, 0, 1, 1], [], []>} : vector<8x256xbf16>, vector<256x64xbf16>, vector<8x64xf32> -> vector<8x64xf32>
    %c8_74 = arith.constant 8 : index
    %c0_75 = arith.constant 0 : index
    %c0_76 = arith.constant 0 : index
    %108 = vector.load %arg4[%c8_74, %c0_75, %c0_76] : memref<9x8x8xbf16, #tpu.memory_space<vmem>>, vector<1x8x8xbf16>
    %109 = vector.shape_cast %108 : vector<1x8x8xbf16> to vector<8x8xbf16>
    %110 = arith.truncf %107 : vector<8x64xf32> to vector<8x64xbf16>
    %cst_77 = arith.constant dense<0.000000e+00> : vector<8x64xf32>
    %111 = tpu.matmul %109, %110, %cst_77 {dimension_numbers = #tpu.dot_dimension_numbers<[1], [0], [0], [1], [0, 0, 1, 1], [], []>} : vector<8x8xbf16>, vector<8x64xbf16>, vector<8x64xf32> -> vector<8x64xf32>
    %112 = arith.addf %104, %111 : vector<8x64xf32>
    %c0_78 = arith.constant 0 : index
    %c0_79 = arith.constant 0 : index
    %113 = vector.load %arg5[%c0_78, %c0_79] : memref<8x1xf32, #tpu.memory_space<vmem>>, vector<8x1xf32>
    %114 = vector.broadcast %113 : vector<8x1xf32> to vector<8x64xf32>
    %115 = arith.addf %112, %114 : vector<8x64xf32>
    %cst_80 = arith.constant 0.000000e+00 : f32
    %116 = vector.broadcast %cst_80 : f32 to vector<8x64xf32>
    %117 = arith.maximumf %115, %116 : vector<8x64xf32>
    %118 = math.absf %117 : vector<8x64xf32>
    %cst_81 = arith.constant dense<0xFF800000> : vector<64xf32>
    %119 = vector.multi_reduction <maximumf>, %118, %cst_81 [0] : vector<8x64xf32> to vector<64xf32>
    %120 = vector.shape_cast %119 : vector<64xf32> to vector<1x64xf32>
    %cst_82 = arith.constant 1.000000e-30 : f32
    %121 = vector.broadcast %cst_82 : f32 to vector<1x64xf32>
    %122 = arith.maximumf %120, %121 : vector<1x64xf32>
    %123 = tpu.bitcast %122 : vector<1x64xf32> -> vector<1x64xi32>
    %c23_i32_83 = arith.constant 23 : i32
    %124 = vector.broadcast %c23_i32_83 : i32 to vector<1x64xi32>
    %125 = arith.shrsi %123, %124 : vector<1x64xi32>
    %c255_i32_84 = arith.constant 255 : i32
    %126 = vector.broadcast %c255_i32_84 : i32 to vector<1x64xi32>
    %127 = arith.andi %125, %126 : vector<1x64xi32>
    %c-2_i32 = arith.constant -2 : i32
    %128 = vector.broadcast %c-2_i32 : i32 to vector<1x64xi32>
    %129 = arith.addi %127, %128 : vector<1x64xi32>
    %c23_i32_85 = arith.constant 23 : i32
    %130 = vector.broadcast %c23_i32_85 : i32 to vector<1x64xi32>
    %131 = arith.shli %129, %130 : vector<1x64xi32>
    %132 = tpu.bitcast %131 : vector<1x64xi32> -> vector<1x64xf32>
    %c254_i32_86 = arith.constant 254 : i32
    %133 = vector.broadcast %c254_i32_86 : i32 to vector<1x64xi32>
    %134 = arith.subi %133, %129 : vector<1x64xi32>
    %c23_i32_87 = arith.constant 23 : i32
    %135 = vector.broadcast %c23_i32_87 : i32 to vector<1x64xi32>
    %136 = arith.shli %134, %135 : vector<1x64xi32>
    %137 = tpu.bitcast %136 : vector<1x64xi32> -> vector<1x64xf32>
    %138 = vector.broadcast %137 : vector<1x64xf32> to vector<8x64xf32>
    %139 = arith.mulf %117, %138 : vector<8x64xf32>
    %140 = math.roundeven %139 : vector<8x64xf32>
    %cst_88 = arith.constant -8.000000e+00 : f32
    %cst_89 = arith.constant 7.000000e+00 : f32
    %141 = vector.broadcast %cst_88 : f32 to vector<8x64xf32>
    %142 = arith.maximumf %141, %140 : vector<8x64xf32>
    %143 = vector.broadcast %cst_89 : f32 to vector<8x64xf32>
    %144 = arith.minimumf %143, %142 : vector<8x64xf32>
    %145 = vector.broadcast %132 : vector<1x64xf32> to vector<8x64xf32>
    %146 = arith.mulf %144, %145 : vector<8x64xf32>
    %147 = arith.truncf %146 : vector<8x64xf32> to vector<8x64xbf16>
    %c0_90 = arith.constant 0 : index
    %c0_91 = arith.constant 0 : index
    %148 = vector.load %arg7[%c0_90, %c0_91] : memref<32x8xbf16, #tpu.memory_space<vmem>>, vector<32x8xbf16>
    %cst_92 = arith.constant dense<0.000000e+00> : vector<32x64xf32>
    %149 = tpu.matmul %148, %147, %cst_92 {dimension_numbers = #tpu.dot_dimension_numbers<[1], [0], [0], [1], [0, 0, 1, 1], [], []>} : vector<32x8xbf16>, vector<8x64xbf16>, vector<32x64xf32> -> vector<32x64xf32>
    %c0_93 = arith.constant 0 : index
    %c0_94 = arith.constant 0 : index
    %150 = vector.load %arg8[%c0_93, %c0_94] : memref<32x1xf32, #tpu.memory_space<vmem>>, vector<32x1xf32>
    %151 = vector.broadcast %150 : vector<32x1xf32> to vector<32x64xf32>
    %152 = arith.addf %149, %151 : vector<32x64xf32>
    %c4_95 = arith.constant 4 : index
    %c0_96 = arith.constant 0 : index
    %c0_97 = arith.constant 0 : index
    %153 = vector.load %arg6[%c4_95, %c0_96, %c0_97] : memref<9x256x64xbf16, #tpu.memory_space<vmem>>, vector<1x256x64xbf16>
    %154 = vector.shape_cast %153 : vector<1x256x64xbf16> to vector<256x64xbf16>
    %cst_98 = arith.constant dense<0.000000e+00> : vector<4x64xf32>
    %155 = tpu.matmul %2, %154, %cst_98 {dimension_numbers = #tpu.dot_dimension_numbers<[1], [0], [0], [1], [0, 0, 1, 1], [], []>} : vector<4x256xbf16>, vector<256x64xbf16>, vector<4x64xf32> -> vector<4x64xf32>
    %c0_99 = arith.constant 0 : index
    %c0_100 = arith.constant 0 : index
    %156 = vector.load %arg9[%c0_99, %c0_100] : memref<32x4xbf16, #tpu.memory_space<vmem>>, vector<32x4xbf16>
    %157 = arith.truncf %155 : vector<4x64xf32> to vector<4x64xbf16>
    %cst_101 = arith.constant dense<0.000000e+00> : vector<32x64xf32>
    %158 = tpu.matmul %156, %157, %cst_101 {dimension_numbers = #tpu.dot_dimension_numbers<[1], [0], [0], [1], [0, 0, 1, 1], [], []>} : vector<32x4xbf16>, vector<4x64xbf16>, vector<32x64xf32> -> vector<32x64xf32>
    %159 = arith.addf %152, %158 : vector<32x64xf32>
    %cst_102 = arith.constant 0.000000e+00 : f32
    %160 = vector.broadcast %cst_102 : f32 to vector<32x64xf32>
    %161 = arith.maximumf %159, %160 : vector<32x64xf32>
    %162 = math.absf %161 : vector<32x64xf32>
    %cst_103 = arith.constant dense<0xFF800000> : vector<64xf32>
    %163 = vector.multi_reduction <maximumf>, %162, %cst_103 [0] : vector<32x64xf32> to vector<64xf32>
    %164 = vector.shape_cast %163 : vector<64xf32> to vector<1x64xf32>
    %cst_104 = arith.constant 1.000000e-30 : f32
    %165 = vector.broadcast %cst_104 : f32 to vector<1x64xf32>
    %166 = arith.maximumf %164, %165 : vector<1x64xf32>
    %167 = tpu.bitcast %166 : vector<1x64xf32> -> vector<1x64xi32>
    %c23_i32_105 = arith.constant 23 : i32
    %168 = vector.broadcast %c23_i32_105 : i32 to vector<1x64xi32>
    %169 = arith.shrsi %167, %168 : vector<1x64xi32>
    %c255_i32_106 = arith.constant 255 : i32
    %170 = vector.broadcast %c255_i32_106 : i32 to vector<1x64xi32>
    %171 = arith.andi %169, %170 : vector<1x64xi32>
    %c-2_i32_107 = arith.constant -2 : i32
    %172 = vector.broadcast %c-2_i32_107 : i32 to vector<1x64xi32>
    %173 = arith.addi %171, %172 : vector<1x64xi32>
    %c23_i32_108 = arith.constant 23 : i32
    %174 = vector.broadcast %c23_i32_108 : i32 to vector<1x64xi32>
    %175 = arith.shli %173, %174 : vector<1x64xi32>
    %176 = tpu.bitcast %175 : vector<1x64xi32> -> vector<1x64xf32>
    %c254_i32_109 = arith.constant 254 : i32
    %177 = vector.broadcast %c254_i32_109 : i32 to vector<1x64xi32>
    %178 = arith.subi %177, %173 : vector<1x64xi32>
    %c23_i32_110 = arith.constant 23 : i32
    %179 = vector.broadcast %c23_i32_110 : i32 to vector<1x64xi32>
    %180 = arith.shli %178, %179 : vector<1x64xi32>
    %181 = tpu.bitcast %180 : vector<1x64xi32> -> vector<1x64xf32>
    %182 = vector.broadcast %181 : vector<1x64xf32> to vector<32x64xf32>
    %183 = arith.mulf %161, %182 : vector<32x64xf32>
    %184 = math.roundeven %183 : vector<32x64xf32>
    %cst_111 = arith.constant -8.000000e+00 : f32
    %cst_112 = arith.constant 7.000000e+00 : f32
    %185 = vector.broadcast %cst_111 : f32 to vector<32x64xf32>
    %186 = arith.maximumf %185, %184 : vector<32x64xf32>
    %187 = vector.broadcast %cst_112 : f32 to vector<32x64xf32>
    %188 = arith.minimumf %187, %186 : vector<32x64xf32>
    %189 = vector.broadcast %176 : vector<1x64xf32> to vector<32x64xf32>
    %190 = arith.mulf %188, %189 : vector<32x64xf32>
    %c0_113 = arith.constant 0 : index
    %c0_114 = arith.constant 0 : index
    %c0_115 = arith.constant 0 : index
    %191 = vector.load %arg10[%c0_113, %c0_114, %c0_115] : memref<1x32x64xf32, #tpu.memory_space<vmem>>, vector<1x32x64xf32>
    %192 = vector.shape_cast %191 : vector<1x32x64xf32> to vector<32x64xf32>
    %193 = vector.shape_cast %190 : vector<32x64xf32> to vector<1x32x64xf32>
    tpu.vector_store %arg10[%c0_113, %c0_114, %c0_115], %193 {strides = array<i32>} : memref<1x32x64xf32, #tpu.memory_space<vmem>>, vector<1x32x64xf32>,
    return
  }
  func.func @transform_0(%arg0: i32) -> (i32, i32, i32) {
    %c0_i32 = arith.constant 0 : i32
    %c0_i32_0 = arith.constant 0 : i32
    %c0_i32_1 = arith.constant 0 : i32
    return %arg0, %c0_i32, %c0_i32_0 : i32, i32, i32
  }
  func.func @transform_1(%arg0: i32) -> (i32, i32) {
    %c0_i32 = arith.constant 0 : i32
    %c0_i32_0 = arith.constant 0 : i32
    %c0_i32_1 = arith.constant 0 : i32
    return %c0_i32, %c0_i32_0 : i32, i32
  }
  func.func @transform_2(%arg0: i32) -> (i32, i32) {
    %c0_i32 = arith.constant 0 : i32
    %c0_i32_0 = arith.constant 0 : i32
    %c0_i32_1 = arith.constant 0 : i32
    return %c0_i32, %c0_i32_0 : i32, i32
  }
  func.func @transform_3(%arg0: i32) -> (i32, i32, i32) {
    %c0_i32 = arith.constant 0 : i32
    %c0_i32_0 = arith.constant 0 : i32
    %c0_i32_1 = arith.constant 0 : i32
    %c0_i32_2 = arith.constant 0 : i32
    return %c0_i32, %c0_i32_0, %c0_i32_1 : i32, i32, i32
  }
  func.func @transform_4(%arg0: i32) -> (i32, i32) {
    %c0_i32 = arith.constant 0 : i32
    %c0_i32_0 = arith.constant 0 : i32
    %c0_i32_1 = arith.constant 0 : i32
    return %c0_i32, %c0_i32_0 : i32, i32
  }
  func.func @transform_5(%arg0: i32) -> (i32, i32, i32) {
    %c0_i32 = arith.constant 0 : i32
    %c0_i32_0 = arith.constant 0 : i32
    %c0_i32_1 = arith.constant 0 : i32
    %c0_i32_2 = arith.constant 0 : i32
    return %c0_i32, %c0_i32_0, %c0_i32_1 : i32, i32, i32
  }
  func.func @transform_6(%arg0: i32) -> (i32, i32) {
    %c0_i32 = arith.constant 0 : i32
    %c0_i32_0 = arith.constant 0 : i32
    %c0_i32_1 = arith.constant 0 : i32
    return %c0_i32, %c0_i32_0 : i32, i32
  }
  func.func @transform_7(%arg0: i32) -> (i32, i32) {
    %c0_i32 = arith.constant 0 : i32
    %c0_i32_0 = arith.constant 0 : i32
    %c0_i32_1 = arith.constant 0 : i32
    return %c0_i32, %c0_i32_0 : i32, i32
  }
  func.func @transform_8(%arg0: i32) -> (i32, i32) {
    %c0_i32 = arith.constant 0 : i32
    %c0_i32_0 = arith.constant 0 : i32
    %c0_i32_1 = arith.constant 0 : i32
    return %c0_i32, %c0_i32_0 : i32, i32
  }
  func.func @transform_9(%arg0: i32) -> (i32, i32, i32) {
    %c0_i32 = arith.constant 0 : i32
    %c0_i32_0 = arith.constant 0 : i32
    %c0_i32_1 = arith.constant 0 : i32
    return %arg0, %c0_i32, %c0_i32_0 : i32, i32, i32
  }
}

</mosaic_0001>

<bundles_post_ra>
// kernel: tpu_custom_call.1
= control target key start
LH: loop header
LB: loop body
LE: loop exit
PB: predicated region body
PF: predicated region fallthrough
CT: control target
= control target key end

     0   :  { %14 = vsyncpa [#allocation3], 0  ;;  %s4324_s0 = inlined_call_operand.vmem [shape: f32[2,4,256], index: 0, kind: input, shape index: {}]   ;;  %s4325_s1 = inlined_call_operand.vmem [shape: bf16[8,4], index: 1, kind: input, shape index: {}]   ;;  %s4326_s2 = inlined_call_operand.vmem [shape: f32[8,1], index: 2, kind: input, shape index: {}]   ;;  %s4327_s3 = inlined_call_operand.vmem [shape: bf16[9,8,8], index: 3, kind: input, shape index: {}]   ;;  %s4328_s4 = inlined_call_operand.vmem [shape: f32[8,1], index: 4, kind: input, shape index: {}]   ;;  %s4329_s5 = inlined_call_operand.vmem [shape: bf16[9,256,64], index: 5, kind: input, shape index: {}]   ;;  %s4330_s6 = inlined_call_operand.vmem [shape: bf16[32,8], index: 6, kind: input, shape index: {}]   ;;  %s4331_s7 = inlined_call_operand.vmem [shape: f32[32,1], index: 7, kind: input, shape index: {}]   ;;  %s4332_s8 = inlined_call_operand.vmem [shape: bf16[32,4], index: 8, kind: input, shape index: {}]   ;;  %s4333_s9 = inlined_call_operand.hbm [shape: f32[2,32,64], index: 9, kind: output, shape index: {}]  }
   0x1   :  { %16 = vsyncpa [#allocation3 + $0x1], 0  ;;  %s3589_s30 = smov 0   ;;  %s3591_s10 = smov 0  }
   0x2   :  { %s3593_s11 = smov 0   ;;  %s3595_s12 = smov 0  }
   0x3 LB: > { %s3610_s13 = sadd.s32 4294967295, %s3534_s12   ;;  %s2338_s14 = sadd.s32 4294967294, %s3534_s12   ;;  %s3534_s12 = sphi %s3595_s12, %s4339_s12   ;;  %s3530_s11 = sphi %s3593_s11, %s4338_s11   ;;  %s3526_s10 = sphi %s3591_s10, %s4337_s10   ;;  %s3522_s30 = sphi %s3589_s30, %s4336_s30  }
   0x4   : > { %s3614_s15 = sadd.s32 1, %s3534_s12   ;;  %s223_s16 = sadd.s32 1, %s3530_s11 }
   0x5   : > { %s220_s17 = ssub.s32 %s3534_s12, %s3614_s15  ;;  %p233_p0 = scmp.ne.s32.totalorder %s3530_s11, %s3526_s10 }
   0x6   : > { %p221_p1 = scmp.eq.s32.totalorder %s220_s17, 0  ;;  %p234_p2 = scmp.eq.s32.totalorder %s3610_s13, 1 }
   0x7   : > { %p239_p3 = scmp.ne.s32.totalorder %s3526_s10, %s3522_s30  ;;  %p240_p4 = scmp.eq.s32.totalorder %s2338_s14, 1 }
   0x8   : > { %s3625_s18 = scalar_select %p221_p1, %s3530_s11, %s223_s16  }
   0x9   : > { %p3627_p5 = por %p234_p2, %p233_p0  ;;  %p3631_p6 = por %p240_p4, %p239_p3 }
   0xa   : > { %p2341_p7 = scmp.ge.s32.totalorder %s3534_s12, 1  ;;  %p290_p8 = scmp.lt.s32.totalorder %s3534_s12, 3 }
   0xc   : > { %p291_p9 = pnand %p2341_p7, %p290_p8 }
   0xd   : > { %p326_p10 = scmp.lt.s32.totalorder (!%p291_p9), %s3610_s13, 1  ;;  %s323_s14 = sand.u32 (!%p291_p9), 1, %s3526_s10  }
   0xe   : > { %294 = sbr.rel (%p291_p9) target bundleno = 1633 (0x661), region = 56  ;;  %s2342_s16 = sshll.u32 (!%p291_p9), %s323_s14, 5 }
   0xf   : > { %s3370_s17 = sshll.u32 (!%p291_p9), %s3610_s13, 5  ;;  %s2261_s26 = scalar_lea.sflag (!%p291_p9), [#allocation3], %s323_s14 }
  0x13   : > { %v3536_v0 = vmov 0   ;;  %v342_v1 = vld [vmem:[%s4326_s2] sm:$0xff]  ;;  %s327_s23 = scalar_select %p326_p10, %s3610_s13, 1  ;;  %vm352_vm0 = vcmask 1041408   ;;  %vm348_vm1 = vcmask 31744   ;;  %v3253_v11 = vld [vmem:[%s4329_s5 + $0xf8] sm:$0xff] }
  0x14   : > { %3469 = vset.pattern.permute.xlu0 %v3536_v0  ;;  %3470 = vset.pattern.permute.xlu1 %v3536_v0  ;;  %v2033_v3 = vld [vmem:[%s4328_s4] sm:$0xff]  ;;  %v3252_v12 = vld [vmem:[%s4329_s5 + $0xf0] sm:$0xff]  ;;  %v3251_v13 = vld [vmem:[%s4329_s5 + $0xe8] sm:$0xff]  ;;  %vm751_vm4 = vcmask 1043456   ;;  %vm747_vm5 = vcmask 64512   ;;  %vm2042_vm6 = vcmask 523264  }
  0x15   : > { %345 = vperm.xlu0 %3469, %v342_v1   ;;  %3471 = vset.pattern.permute.xlu2 %v3536_v0  ;;  %s3221_s24 = sshll.u32 %s327_s23, 3  ;;  %v341_v10 = vld [vmem:[%s4325_s1] sm:$0xf]  ;;  %v3245_v15 = vld [vmem:[%s4329_s5 + $0xb8] sm:$0xff]  ;;  %v3244_v17 = vld [vmem:[%s4329_s5 + $0xb0] sm:$0xff]  ;;  %s2272_s23 = scalar_lea.hbm %s4333_s9, %s3370_s17 }
  0x16   : > { %s330_s27 = scalar_lea.vmem %s4324_s0, %s3221_s24  ;;  %v3250_v14 = vld [vmem:[%s4329_s5 + $0xe0] sm:$0xff]  ;;  %v3249_v16 = vld [vmem:[%s4329_s5 + $0xd8] sm:$0xff]  ;;  %v3248_v18 = vld [vmem:[%s4329_s5 + $0xd0] sm:$0xff]  ;;  %s325_s13 = scalar_lea.vmem [#allocation2], %s2342_s16 }
  0x17   : > { %v332_v2 = vld [vmem:[%s330_s27] sm:$0xff]  ;;  %v3243_v19 = vld [vmem:[%s4329_s5 + $0xa8] sm:$0xff]  ;;  %v3229_v22 = vld [vmem:[%s4329_s5 + $0x38] sm:$0xff]  ;;  %s2273_s24 = sshll.u32 %s325_s13, 4  ;;  %s2275_s25 = sshll.u32 %s2272_s23, 4  ;;  %s2274_s24 = int_to_ptr.vmem [resolvable:$true] %s2273_s24  ;;  %s2276_s25 = int_to_ptr.hbm [resolvable:$true] %s2275_s25 }
  0x18   : > { %334 = vst [vmem:[#allocation1] ss:$2 sm:$0xff] %v332_v2  ;;  %v3247_v20 = vld [vmem:[%s4329_s5 + $0xc8] sm:$0xff]  ;;  %v3242_v21 = vld [vmem:[%s4329_s5 + $0xa0] sm:$0xff]  ;;  %v3237_v23 = vld [vmem:[%s4329_s5 + $0x78] sm:$0xff]  ;;  %561 = vmatpush.bf16.msra.mxu2 %v3229_v22  ;;  %s3486_s27 = sshra.s32 %s2276_s25, 4  ;;  %s3487_s27 = int_to_ptr.hbm [resolvable:$true] %s3486_s27 }
  0x19   : > { %574 = vmatpush.bf16.msra.mxu3 %v3237_v23  ;;  %v3246_v24 = vld [vmem:[%s4329_s5 + $0xc0] sm:$0xff]  ;;  %v3241_v25 = vld [vmem:[%s4329_s5 + $0x98] sm:$0xff]  ;;  %v3228_v27 = vld [vmem:[%s4329_s5 + $0x30] sm:$0xff]  ;;  %s3488_s28 = scalar_lea.hbm %s3487_s27, 32  ;;  %s3492_s17 = scalar_lea.hbm %s4333_s9, 64 }
  0x1a   : > { %v3269_v26 = vld [vmem:[%s4329_s5 + $0x178] sm:$0xff]  ;;  %v3236_v28 = vld [vmem:[%s4329_s5 + $0x70] sm:$0xff]  ;;  %v3227_v31 = vld [vmem:[%s4329_s5 + $0x28] sm:$0xff]  ;;  %p3489_p11 = scmp.ne.s32.totalorder %s3487_s27, %s3488_s28  ;;  %p3493_p0 = scmp.lt.s32.totalorder %s3487_s27, %s4333_s9 }
  0x1b   : > { %v3240_v29 = vld [vmem:[%s4329_s5 + $0x90] sm:$0xff]  ;;  %v3235_v32 = vld [vmem:[%s4329_s5 + $0x68] sm:$0xff]  ;;  %v3226_v35 = vld [vmem:[%s4329_s5 + $0x20] sm:$0xff]  ;;  %p3494_p1 = scmp.lt.s32.totalorder %s3492_s17, %s3488_s28 }
  0x1c   : > { %562 = vmatpush.bf16.msra.mxu2 %v3228_v27  ;;  %v3268_v30 = vld [vmem:[%s4329_s5 + $0x170] sm:$0xff]  ;;  %v3239_v33 = vld [vmem:[%s4329_s5 + $0x88] sm:$0xff]  ;;  %v3234_v36 = vld [vmem:[%s4329_s5 + $0x60] sm:$0xff]  ;;  %p3490_p12 = pnand %p3489_p11, %p3627_p5 }
  0x1d   : > { %2036 = vperm.xlu0 %3469, %v2033_v3   ;;  %575 = vmatpush.bf16.msra.mxu3 %v3236_v28  ;;  %v3267_v34 = vld [vmem:[%s4329_s5 + $0x168] sm:$0xff]  ;;  %v3238_v42 = vld [vmem:[%s4329_s5 + $0x80] sm:$0xff]  ;;  %v3225_v44 = vld [vmem:[%s4329_s5 + $0x18] sm:$0xff]  ;;  %p3495_p2 = por %p3494_p1, %p3493_p0 }
  0x1e   : > { %v3266_v43 = vld [vmem:[%s4329_s5 + $0x160] sm:$0xff]  ;;  %v3233_v45 = vld [vmem:[%s4329_s5 + $0x58] sm:$0xff]  ;;  %v3224_v52 = vld [vmem:[%s4329_s5 + $0x10] sm:$0xff]  ;;  %p3491_p13 = pneg %p3490_p12 }
  0x1f   : > { %v335_v4 = vld.sshfl [vmem:[#allocation1] sm:$0xff pattern:$0x75316420]  ;;  %v336_v5 = vld.sshfl [vmem:[#allocation1 + $0x8] sm:$0xff pattern:$0x75316420] }
  0x20   : > { %v3648_v6 = vpack.c.bf16 %v335_v4, %v335_v4  ;;  %v3650_v7 = vpack.c.bf16 %v336_v5, %v336_v5  ;;  %563 = vmatpush.bf16.msra.mxu2 %v3227_v31  ;;  %v3261_v46 = vld [vmem:[%s4329_s5 + $0x138] sm:$0xff]  ;;  %v3232_v53 = vld [vmem:[%s4329_s5 + $0x50] sm:$0xff]  ;;  %v3223_v62 = vld [vmem:[%s4329_s5 + $0x8] sm:$0xff]  ;;  %p3496_p3 = pnand %p3495_p2, %p3491_p13 }
  0x21   : > { %576 = vmatpush.bf16.msra.mxu3 %v3235_v32  ;;  %v3265_v51 = vld [vmem:[%s4329_s5 + $0x158] sm:$0xff]  ;;  %v3260_v54 = vld [vmem:[%s4329_s5 + $0x130] sm:$0xff]  ;;  %v3231_v63 = vld [vmem:[%s4329_s5 + $0x48] sm:$0xff] }
  0x22   : > { %v354_v8 = vsel %vm352_vm0, %v3648_v6, 0  ;;  %v357_v9 = vsel %vm352_vm0, %v3650_v7, 0  ;;  %v3264_v61 = vld [vmem:[%s4329_s5 + $0x150] sm:$0xff]  ;;  %v3259_v0 = vld [vmem:[%s4329_s5 + $0x128] sm:$0xff]  ;;  %v3254_v31 = vld [vmem:[%s4329_s5 + $0x100] sm:$0xff] }
  0x23   : > { %366 = vmatpush.bf16.msra.mxu0 %v354_v8  ;;  %379 = vmatpush.bf16.msra.mxu1 %v357_v9  ;;  %v3263_v5 = vld [vmem:[%s4329_s5 + $0x148] sm:$0xff]  ;;  %v3222_v8 = vld [vmem:[%s4329_s5] sm:$0xff] }
  0x24   : > { %564 = vmatpush.bf16.msra.mxu2 %v3226_v35  ;;  %v3230_v9 = vld [vmem:[%s4329_s5 + $0x40] sm:$0xff] }
  0x25   : > { %577 = vmatpush.bf16.msra.mxu3 %v3234_v36 }
  0x26   : > { %2345 = vmatmul.msk.bf16.vlgmr.msra.gmra.mxu0 %vm348_vm1, %v341_v10  ;;  %2346 = vmatmul.msk.bf16.vlgmr.msra.gmra.mxu1 %vm348_vm1, %v341_v10  ;;  %v3258_v10 = vld [vmem:[%s4329_s5 + $0x120] sm:$0xff] }
  0x27   : > { %731 = vmatpush.bf16.msrb.mxu1 %v3253_v11  ;;  %718 = vmatpush.bf16.msrb.mxu0 %v3245_v15  ;;  %v3262_v15 = vld [vmem:[%s4329_s5 + $0x140] sm:$0xff] }
  0x28   : > { %565 = vmatpush.bf16.msra.mxu2 %v3225_v44 }
  0x29   : > { %578 = vmatpush.bf16.msra.mxu3 %v3233_v45 }
  0x2b   : > { %732 = vmatpush.bf16.msrb.mxu1 %v3252_v12  ;;  %719 = vmatpush.bf16.msrb.mxu0 %v3244_v17 }
  0x2c   : > { %566 = vmatpush.bf16.msra.mxu2 %v3224_v52 }
  0x2d   : > { %579 = vmatpush.bf16.msra.mxu3 %v3232_v53 }
  0x2f   : > { %733 = vmatpush.bf16.msrb.mxu1 %v3251_v13  ;;  %720 = vmatpush.bf16.msrb.mxu0 %v3243_v19 }
  0x30   : > { %567 = vmatpush.bf16.msra.mxu2 %v3223_v62  ;;  %v3854_v62 = vld [vmem:[%s4329_s5 + $0x218] sm:$0xff] }
  0x31   : > { %580 = vmatpush.bf16.msra.mxu3 %v3231_v63  ;;  %v3862_v63 = vld [vmem:[%s4329_s5 + $0x210] sm:$0xff] }
  0x33   : > { %734 = vmatpush.bf16.msrb.mxu1 %v3250_v14  ;;  %721 = vmatpush.bf16.msrb.mxu0 %v3242_v21  ;;  %v3256_v21 = vld [vmem:[%s4329_s5 + $0x110] sm:$0xff] }
  0x34   : > { %568 = vmatpush.bf16.msra.mxu2 %v3222_v8 }
  0x35   : > { %581 = vmatpush.bf16.msra.mxu3 %v3230_v9 }
  0x37   : > { %735 = vmatpush.bf16.msrb.mxu1 %v3249_v16  ;;  %722 = vmatpush.bf16.msrb.mxu0 %v3241_v25  ;;  %v3257_v16 = vld [vmem:[%s4329_s5 + $0x118] sm:$0xff] }
  0x3b   : > { %736 = vmatpush.bf16.msrb.mxu1 %v3248_v18  ;;  %723 = vmatpush.bf16.msrb.mxu0 %v3240_v29 }
  0x3f   : > { %737 = vmatpush.bf16.msrb.mxu1 %v3247_v20  ;;  %724 = vmatpush.bf16.msrb.mxu0 %v3239_v33 }
  0x43   : > { %738 = vmatpush.bf16.msrb.mxu1 %v3246_v24  ;;  %725 = vmatpush.bf16.msrb.mxu0 %v3238_v42 }
  0x47   : > { %929 = vmatpush.bf16.msra.mxu1 %v3269_v26  ;;  %916 = vmatpush.bf16.msra.mxu0 %v3261_v46  ;;  %v3255_v26 = vld [vmem:[%s4329_s5 + $0x108] sm:$0xff] }
  0x4b   : > { %930 = vmatpush.bf16.msra.mxu1 %v3268_v30  ;;  %917 = vmatpush.bf16.msra.mxu0 %v3260_v54 }
  0x4f   : > { %931 = vmatpush.bf16.msra.mxu1 %v3267_v34  ;;  %918 = vmatpush.bf16.msra.mxu0 %v3259_v0  ;;  %v3868_v0 = vld [vmem:[%s4329_s5 + $0x208] sm:$0xff] }
  0x53   : > { %932 = vmatpush.bf16.msra.mxu1 %v3266_v43  ;;  %919 = vmatpush.bf16.msra.mxu0 %v3258_v10 }
  0x57   : > { %933 = vmatpush.bf16.msra.mxu1 %v3265_v51  ;;  %920 = vmatpush.bf16.msra.mxu0 %v3257_v16  ;;  %v3277_v16 = vld [vmem:[%s4329_s5 + $0x1b8] sm:$0xff] }
  0x5b   : > { %934 = vmatpush.bf16.msra.mxu1 %v3264_v61  ;;  %921 = vmatpush.bf16.msra.mxu0 %v3256_v21  ;;  %v3848_v61 = vld [vmem:[%s4329_s5 + $0x220] sm:$0xff] }
  0x5f   : > { %935 = vmatpush.bf16.msra.mxu1 %v3263_v5  ;;  %922 = vmatpush.bf16.msra.mxu0 %v3255_v26 }
  0x63   : > { %936 = vmatpush.bf16.msra.mxu1 %v3262_v15  ;;  %923 = vmatpush.bf16.msra.mxu0 %v3254_v31 }
  0x87   : > { %v346_v37 = vpop.permute.xlu0 %345 }
  0xa3   : > { %v368_v38 = vpop.f32.mrf.mxu0  ;;  %v381_v39 = vpop.f32.mrf.mxu1 }
  0xa4   : > { %v3739_v40 = vadd.f32 %v368_v38, %v346_v37  ;;  %v3741_v41 = vadd.f32 %v381_v39, %v346_v37 }
  0xa6   : > { %v385_v47 = vmax.f32 %v3739_v40, 0.0  ;;  %v386_v48 = vmax.f32 %v3741_v41, 0.0 }
  0xa8   : > { %v387_v49 = vand.u32 2147483647, %v385_v47  ;;  %v388_v50 = vand.u32 2147483647, %v386_v48 }
  0xaa   : > { %v389_v55 = vrot.slane %v387_v49, 4  ;;  %v395_v56 = vrot.slane %v388_v50, 4 }
  0xab   : > { %v370_v57 = vpop.f32.mrf.mxu0  ;;  %v383_v58 = vpop.f32.mrf.mxu1 }
  0xac   : > { %v390_v59 = vmax.f32 %v387_v49, %v389_v55  ;;  %v396_v60 = vmax.f32 %v388_v50, %v395_v56  ;;  %v3824_v57 = vld [vmem:[%s4329_s5 + $0x238] sm:$0xff] }
  0xae   : > { %v391_v1 = vrot.slane %v390_v59, 2  ;;  %v397_v2 = vrot.slane %v396_v60, 2 }
  0xb0   : > { %v392_v3 = vmax.f32 %v390_v59, %v391_v1  ;;  %v398_v4 = vmax.f32 %v396_v60, %v397_v2  ;;  %v3836_v59 = vld [vmem:[%s4329_s5 + $0x230] sm:$0xff]  ;;  %v3842_v60 = vld [vmem:[%s4329_s5 + $0x228] sm:$0xff]  ;;  %v3874_v1 = vld [vmem:[%s4329_s5 + $0x200] sm:$0xff] }
  0xb2   : > { %v393_v11 = vrot.slane %v392_v3, 1  ;;  %v399_v12 = vrot.slane %v398_v4, 1 }
  0xb4   : > { %v394_v13 = vmax.f32 %v392_v3, %v393_v11  ;;  %v400_v14 = vmax.f32 %v398_v4, %v399_v12  ;;  %v2507_v11 = vld [vmem:[%s4327_s3 + $0x4] sm:$0xf] }
  0xb6   : > { %v401_v17 = vmax.f32 %v394_v13, 1e-30  ;;  %v402_v18 = vmax.f32 %v400_v14, 1e-30 }
  0xb8   : > { %v405_v19 = vshra.s32 %v401_v17, 23  ;;  %v406_v20 = vshra.s32 %v402_v18, 23  ;;  %v587_v18 = vld [vmem:[%s4327_s3] sm:$0xf] }
  0xba   : > { %v407_v22 = vand.u32 255, %v405_v19  ;;  %v408_v23 = vand.u32 255, %v406_v20  ;;  %v3276_v20 = vld [vmem:[%s4329_s5 + $0x1b0] sm:$0xff] }
  0xbc   : > { %v409_v24 = vadd.s32 4294967292, %v407_v22  ;;  %v410_v25 = vadd.s32 4294967292, %v408_v23 }
  0xbe   : > { %v415_v27 = vsub.s32 254, %v409_v24  ;;  %v416_v28 = vsub.s32 254, %v410_v25  ;;  %v412_v52 = vshll.u32 %v410_v25, 23  ;;  %v3275_v25 = vld [vmem:[%s4329_s5 + $0x1a8] sm:$0xff] }
  0xc0   : > { %v417_v29 = vshll.u32 %v415_v27, 23  ;;  %v418_v30 = vshll.u32 %v416_v28, 23  ;;  %v3285_v27 = vld [vmem:[%s4329_s5 + $0x1f8] sm:$0xff] }
  0xc2   : > { %v421_v32 = vmul.f32 %v417_v29, %v385_v47  ;;  %v422_v33 = vmul.f32 %v418_v30, %v386_v48  ;;  %v411_v48 = vshll.u32 %v409_v24, 23  ;;  %v3274_v29 = vld [vmem:[%s4329_s5 + $0x1a0] sm:$0xff]  ;;  %v2606_v30 = vld [vmem:[%s4327_s3 + $0x8] sm:$0xf] }
  0xc4   : > { %v3373_v34 = vcvt.f32.s32 %v421_v32  ;;  %v3381_v35 = vcvt.f32.s32 %v422_v33  ;;  %v3371_v37 = vand.u32 2147483647, %v421_v32  ;;  %v3376_v42 = vand.u32 2147483648, %v421_v32 }
  0xc5   : > { %v3379_v43 = vand.u32 2147483647, %v422_v33  ;;  %v3384_v45 = vand.u32 2147483648, %v422_v33 }
  0xc6   : > { %v3374_v36 = vcvt.s32.f32 %v3373_v34  ;;  %v3382_v38 = vcvt.s32.f32 %v3381_v35  ;;  %vm3372_vm2 = vcmp.lt.f32.partialorder %v3371_v37, 8388608.0  ;;  %v3273_v34 = vld [vmem:[%s4329_s5 + $0x198] sm:$0xff]  ;;  %v3283_v35 = vld [vmem:[%s4329_s5 + $0x1e8] sm:$0xff]  ;;  %v3282_v37 = vld [vmem:[%s4329_s5 + $0x1e0] sm:$0xff] }
  0xc7   : > { %vm3380_vm3 = vcmp.lt.f32.partialorder %v3379_v43, 8388608.0  ;;  %v3270_v43 = vld [vmem:[%s4329_s5 + $0x180] sm:$0xff] }
  0xc8   : > { %v3375_v39 = vand.u32 2147483647, %v3374_v36  ;;  %v3383_v44 = vand.u32 2147483647, %v3382_v38  ;;  %v3272_v36 = vld [vmem:[%s4329_s5 + $0x190] sm:$0xff] }
  0xca   : > { %v3377_v46 = vor.u32 %v3376_v42, %v3375_v39  ;;  %v3385_v49 = vor.u32 %v3384_v45, %v3383_v44  ;;  %v3271_v39 = vld [vmem:[%s4329_s5 + $0x188] sm:$0xff]  ;;  %v3281_v42 = vld [vmem:[%s4329_s5 + $0x1d8] sm:$0xff]  ;;  %v3280_v45 = vld [vmem:[%s4329_s5 + $0x1d0] sm:$0xff] }
  0xcb   : > { %v3937_v44 = vld [vmem:[%s4329_s5 + $0x278] sm:$0xff] }
  0xcc   : > { %v3378_v50 = vsel %vm3372_vm2, %v3377_v46, %v421_v32  ;;  %v3386_v47 = vsel %vm3380_vm3, %v3385_v49, %v422_v33  ;;  %v3284_v32 = vld [vmem:[%s4329_s5 + $0x1f0] sm:$0xff] }
  0xcd   : > { %v425_v40 = vmax.f32 %v3378_v50, -32.0  ;;  %v426_v41 = vmax.f32 %v3386_v47, -32.0  ;;  %v3946_v49 = vld [vmem:[%s4329_s5 + $0x270] sm:$0xff]  ;;  %v3279_v50 = vld [vmem:[%s4329_s5 + $0x1c8] sm:$0xff]  ;;  %v3278_v47 = vld [vmem:[%s4329_s5 + $0x1c0] sm:$0xff] }
  0xcf   : > { %v427_v51 = vmin.f32 %v425_v40, 31.0  ;;  %v428_v53 = vmin.f32 %v426_v41, 31.0  ;;  %v3956_v40 = vld [vmem:[%s4329_s5 + $0x268] sm:$0xff]  ;;  %v3309_v41 = vld [vmem:[%s4329_s5 + $0x2b8] sm:$0xff] }
  0xd1   : > { %v429_v54 = vmul.f32 %v427_v51, %v411_v48  ;;  %v430_v55 = vmul.f32 %v428_v53, %v412_v52  ;;  %v3968_v48 = vld [vmem:[%s4329_s5 + $0x260] sm:$0xff]  ;;  %v3308_v51 = vld [vmem:[%s4329_s5 + $0x2b0] sm:$0xff]  ;;  %v3978_v52 = vld [vmem:[%s4329_s5 + $0x258] sm:$0xff] }
  0xd2   : > { %v3307_v53 = vld [vmem:[%s4329_s5 + $0x2a8] sm:$0xff] }
  0xd3   : > { %v3819_v56 = vpack.c.bf16 %v429_v54, %v429_v54  ;;  %v3826_v58 = vpack.c.bf16 %v430_v55, %v430_v55  ;;  %v3987_v54 = vld [vmem:[%s4329_s5 + $0x250] sm:$0xff]  ;;  %v3306_v55 = vld [vmem:[%s4329_s5 + $0x2a0] sm:$0xff] }
  0xd5   : > { %569 = vmatmul.bf16.vlgmr.msra.gmra.mxu2 %v3819_v56  ;;  %726 = vmatmul.bf16.vlgmr.msrb.gmra.mxu0 %v3819_v56 }
  0xd6   : > { %582 = vmatmul.bf16.vlgmr.msra.gmra.mxu3 %v3826_v58  ;;  %739 = vmatmul.bf16.vlgmr.msrb.gmra.mxu1 %v3826_v58 }
  0xd7   : > { %1272 = vmatpush.bf16.msrb.mxu1 %v3824_v57 }
  0xdb   : > { %1273 = vmatpush.bf16.msrb.mxu1 %v3836_v59 }
  0xdf   : > { %1274 = vmatpush.bf16.msrb.mxu1 %v3842_v60 }
  0xe3   : > { %1275 = vmatpush.bf16.msrb.mxu1 %v3848_v61 }
  0xe5   : > { %924 = vmatmul.bf16.vlgmr.msra.gmra.mxu0 %v3819_v56 }
  0xe6   : > { %937 = vmatmul.bf16.vlgmr.msra.gmra.mxu1 %v3826_v58 }
  0xe7   : > { %1276 = vmatpush.bf16.msrb.mxu1 %v3854_v62 }
  0xeb   : > { %1277 = vmatpush.bf16.msrb.mxu1 %v3862_v63 }
  0xef   : > { %1278 = vmatpush.bf16.msrb.mxu1 %v3868_v0 }
  0xf3   : > { %1279 = vmatpush.bf16.msrb.mxu1 %v3874_v1 }
  0xf6   : > { %1280 = vmatmul.bf16.vlgmr.msrb.gmra.mxu1 %v3819_v56 }
 0x152   : > { %v727_v2 = vpop.f32.mrf.mxu0 }
 0x153   : > { %v740_v3 = vpop.f32.mrf.mxu1 }
 0x154   : > { %v741_v4 = vadd.f32 %v740_v3, %v727_v2  ;;  %v3996_v2 = vld [vmem:[%s4329_s5 + $0x248] sm:$0xff]  ;;  %v3305_v3 = vld [vmem:[%s4329_s5 + $0x298] sm:$0xff] }
 0x156   : > { %v746_v5 = vpack.c.bf16 %v741_v4, %v741_v4  ;;  %v4005_v4 = vld [vmem:[%s4329_s5 + $0x240] sm:$0xff] }
 0x158   : > { %v570_v8 = vpop.f32.mrf.mxu2  ;;  %v753_v9 = vsel %vm751_vm4, %v746_v5, 0  ;;  %v3325_v5 = vld [vmem:[%s4329_s5 + $0x338] sm:$0xff] }
 0x159   : > { %v583_v10 = vpop.f32.mrf.mxu3  ;;  %762 = vmatpush.bf16.msrb.mxu2 %v753_v9  ;;  %v3324_v9 = vld [vmem:[%s4329_s5 + $0x330] sm:$0xff] }
 0x15a   : > { %v584_v12 = vadd.f32 %v583_v10, %v570_v8  ;;  %v729_v13 = vpop.f32.mrf.mxu0  ;;  %v3304_v8 = vld [vmem:[%s4329_s5 + $0x290] sm:$0xff]  ;;  %v3303_v10 = vld [vmem:[%s4329_s5 + $0x288] sm:$0xff] }
 0x15b   : > { %v742_v14 = vpop.f32.mrf.mxu1  ;;  %v3322_v13 = vld [vmem:[%s4329_s5 + $0x320] sm:$0xff] }
 0x15c   : > { %v588_v15 = vpack.c.bf16 %v584_v12, %v584_v12  ;;  %2508 = vmatmul.msk.bf16.vlgmr.msrb.gmra.mxu2 %vm747_vm5, %v2507_v11  ;;  %v3323_v11 = vld [vmem:[%s4329_s5 + $0x328] sm:$0xff]  ;;  %v3302_v12 = vld [vmem:[%s4329_s5 + $0x280] sm:$0xff]  ;;  %v3321_v14 = vld [vmem:[%s4329_s5 + $0x318] sm:$0xff] }
 0x15e   : > { %v772_v17 = vsel %vm751_vm4, %v588_v15, 0  ;;  %v3320_v15 = vld [vmem:[%s4329_s5 + $0x310] sm:$0xff] }
 0x15f   : > { %781 = vmatpush.bf16.msrb.mxu3 %v772_v17  ;;  %v3318_v17 = vld [vmem:[%s4329_s5 + $0x300] sm:$0xff] }
 0x160   : > { %v572_v19 = vpop.f32.mrf.mxu2 }
 0x161   : > { %v585_v21 = vpop.f32.mrf.mxu3 }
 0x162   : > { %v925_v22 = vpop.f32.mrf.mxu0  ;;  %2509 = vmatmul.msk.bf16.vlgmr.msrb.gmra.mxu3 %vm747_vm5, %v587_v18 }
 0x163   : > { %1094 = vmatpush.bf16.msra.mxu3 %v3277_v16  ;;  %v938_v23 = vpop.f32.mrf.mxu1  ;;  %v3319_v16 = vld [vmem:[%s4329_s5 + $0x308] sm:$0xff] }
 0x164   : > { %v939_v24 = vadd.f32 %v938_v23, %v925_v22 }
 0x166   : > { %v944_v26 = vpack.c.bf16 %v939_v24, %v939_v24 }
 0x167   : > { %1095 = vmatpush.bf16.msra.mxu3 %v3276_v20 }
 0x168   : > { %v949_v28 = vsel %vm751_vm4, %v944_v26, 0 }
 0x169   : > { %958 = vmatpush.bf16.msra.mxu2 %v949_v28 }
 0x16a   : > { %v927_v31 = vpop.f32.mrf.mxu0 }
 0x16b   : > { %1096 = vmatpush.bf16.msra.mxu3 %v3275_v25  ;;  %v940_v33 = vpop.f32.mrf.mxu1 }
 0x16c   : > { %2607 = vmatmul.msk.bf16.vlgmr.msra.gmra.mxu2 %vm747_vm5, %v2606_v30 }
 0x16d   : > { %1107 = vmatpush.bf16.msrb.mxu2 %v3285_v27 }
 0x16f   : > { %1097 = vmatpush.bf16.msra.mxu3 %v3274_v29 }
 0x171   : > { %1108 = vmatpush.bf16.msrb.mxu2 %v3284_v32  ;;  %v2704_v32 = vld [vmem:[%s4327_s3 + $0xc] sm:$0xf] }
 0x173   : > { %1098 = vmatpush.bf16.msra.mxu3 %v3273_v34  ;;  %v3923_v38 = vpop.f32.mrf.mxu1 }
 0x175   : > { %1109 = vmatpush.bf16.msrb.mxu2 %v3283_v35 }
 0x177   : > { %1099 = vmatpush.bf16.msra.mxu3 %v3272_v36 }
 0x179   : > { %1110 = vmatpush.bf16.msrb.mxu2 %v3282_v37  ;;  %v3317_v37 = vld [vmem:[%s4329_s5 + $0x2f8] sm:$0xff] }
 0x17b   : > { %1100 = vmatpush.bf16.msra.mxu3 %v3271_v39  ;;  %v1283_v46 = vpop.f32.mrf.mxu1 }
 0x17c   : > { %v3315_v46 = vld [vmem:[%s4329_s5 + $0x2e8] sm:$0xff] }
 0x17d   : > { %1111 = vmatpush.bf16.msrb.mxu2 %v3281_v42  ;;  %v2802_v42 = vld [vmem:[%s4327_s3 + $0x10] sm:$0xf] }
 0x17f   : > { %1101 = vmatpush.bf16.msra.mxu3 %v3270_v43  ;;  %v3316_v43 = vld [vmem:[%s4329_s5 + $0x2f0] sm:$0xff] }
 0x181   : > { %1112 = vmatpush.bf16.msrb.mxu2 %v3280_v45 }
 0x182   : > { %1102 = vmatmul.bf16.vlgmr.msra.gmra.mxu3 %v3819_v56 }
 0x183   : > { %1285 = vmatpush.bf16.msrb.mxu3 %v3937_v44 }
 0x185   : > { %1113 = vmatpush.bf16.msrb.mxu2 %v3279_v50  ;;  %v3314_v50 = vld [vmem:[%s4329_s5 + $0x2e0] sm:$0xff] }
 0x187   : > { %1286 = vmatpush.bf16.msrb.mxu3 %v3946_v49 }
 0x189   : > { %1114 = vmatpush.bf16.msrb.mxu2 %v3278_v47 }
 0x18b   : > { %1287 = vmatpush.bf16.msrb.mxu3 %v3956_v40 }
 0x18c   : > { %1115 = vmatmul.bf16.vlgmr.msrb.gmra.mxu2 %v3826_v58 }
 0x18d   : > { %1450 = vmatpush.bf16.msra.mxu2 %v3309_v41  ;;  %v3313_v41 = vld [vmem:[%s4329_s5 + $0x2d8] sm:$0xff] }
 0x18f   : > { %1288 = vmatpush.bf16.msrb.mxu3 %v3968_v48 }
 0x191   : > { %1451 = vmatpush.bf16.msra.mxu2 %v3308_v51  ;;  %v3312_v51 = vld [vmem:[%s4329_s5 + $0x2d0] sm:$0xff] }
 0x193   : > { %1289 = vmatpush.bf16.msrb.mxu3 %v3978_v52 }
 0x195   : > { %1452 = vmatpush.bf16.msra.mxu2 %v3307_v53  ;;  %v3311_v53 = vld [vmem:[%s4329_s5 + $0x2c8] sm:$0xff] }
 0x197   : > { %1290 = vmatpush.bf16.msrb.mxu3 %v3987_v54 }
 0x199   : > { %1453 = vmatpush.bf16.msra.mxu2 %v3306_v55 }
 0x19b   : > { %1291 = vmatpush.bf16.msrb.mxu3 %v3996_v2 }
 0x19d   : > { %1454 = vmatpush.bf16.msra.mxu2 %v3305_v3  ;;  %v3310_v3 = vld [vmem:[%s4329_s5 + $0x2c0] sm:$0xff] }
 0x19f   : > { %1292 = vmatpush.bf16.msrb.mxu3 %v4005_v4 }
 0x1a1   : > { %1455 = vmatpush.bf16.msra.mxu2 %v3304_v8  ;;  %v3340_v8 = vld [vmem:[%s4329_s5 + $0x3b0] sm:$0xff] }
 0x1a2   : > { %1293 = vmatmul.bf16.vlgmr.msrb.gmra.mxu3 %v3826_v58 }
 0x1a3   : > { %1628 = vmatpush.bf16.msra.mxu3 %v3325_v5  ;;  %v3341_v5 = vld [vmem:[%s4329_s5 + $0x3b8] sm:$0xff] }
 0x1a5   : > { %1456 = vmatpush.bf16.msra.mxu2 %v3303_v10  ;;  %v3339_v10 = vld [vmem:[%s4329_s5 + $0x3a8] sm:$0xff] }
 0x1a7   : > { %1629 = vmatpush.bf16.msra.mxu3 %v3324_v9 }
 0x1a9   : > { %1457 = vmatpush.bf16.msra.mxu2 %v3302_v12  ;;  %v3337_v12 = vld [vmem:[%s4329_s5 + $0x398] sm:$0xff] }
 0x1ab   : > { %1630 = vmatpush.bf16.msra.mxu3 %v3323_v11  ;;  %v3338_v11 = vld [vmem:[%s4329_s5 + $0x3a0] sm:$0xff] }
 0x1ac   : > { %1458 = vmatmul.bf16.vlgmr.msra.gmra.mxu2 %v3819_v56 }
 0x1af   : > { %1631 = vmatpush.bf16.msra.mxu3 %v3322_v13  ;;  %v3336_v13 = vld [vmem:[%s4329_s5 + $0x390] sm:$0xff] }
 0x1b3   : > { %1632 = vmatpush.bf16.msra.mxu3 %v3321_v14  ;;  %v3335_v14 = vld [vmem:[%s4329_s5 + $0x388] sm:$0xff] }
 0x1b7   : > { %1633 = vmatpush.bf16.msra.mxu3 %v3320_v15  ;;  %v3334_v15 = vld [vmem:[%s4329_s5 + $0x380] sm:$0xff] }
 0x1bb   : > { %1634 = vmatpush.bf16.msra.mxu3 %v3319_v16 }
 0x1bf   : > { %1635 = vmatpush.bf16.msra.mxu3 %v3318_v17 }
 0x1c2   : > { %1636 = vmatmul.bf16.vlgmr.msra.gmra.mxu3 %v3819_v56 }
 0x1df   : > { %v764_v18 = vpop.f32.mrf.mxu2 }
 0x1e5   : > { %v783_v19 = vpop.f32.mrf.mxu3 }
 0x1e6   : > { %v784_v20 = vadd.f32 %v783_v19, %v764_v18 }
 0x1e7   : > { %v766_v21 = vpop.f32.mrf.mxu2 }
 0x1ed   : > { %v785_v22 = vpop.f32.mrf.mxu3 }
 0x1ef   : > { %v960_v23 = vpop.f32.mrf.mxu2 }
 0x1f0   : > { %v964_v24 = vadd.f32 %v960_v23, %v784_v20 }
 0x1f7   : > { %v962_v25 = vpop.f32.mrf.mxu2 }
 0x205   : > { %v1103_v26 = vpop.f32.mrf.mxu3 }
 0x20d   : > { %v1105_v27 = vpop.f32.mrf.mxu3 }
 0x20f   : > { %v1116_v28 = vpop.f32.mrf.mxu2 }
 0x210   : > { %v1117_v29 = vadd.f32 %v1116_v28, %v1103_v26  ;;  %v3333_v26 = vld [vmem:[%s4329_s5 + $0x378] sm:$0xff]  ;;  %v2900_v28 = vld [vmem:[%s4327_s3 + $0x14] sm:$0xf] }
 0x212   : > { %v1122_v30 = vpack.c.bf16 %v1117_v29, %v1117_v29 }
 0x214   : > { %v1127_v31 = vsel %vm751_vm4, %v1122_v30, 0  ;;  %v3331_v30 = vld [vmem:[%s4329_s5 + $0x368] sm:$0xff] }
 0x215   : > { %1136 = vmatpush.bf16.msrb.mxu0 %v1127_v31  ;;  %v3330_v31 = vld [vmem:[%s4329_s5 + $0x360] sm:$0xff] }
 0x217   : > { %v1118_v33 = vpop.f32.mrf.mxu2 }
 0x218   : > { %2705 = vmatmul.msk.bf16.vlgmr.msrb.gmra.mxu0 %vm747_vm5, %v2704_v32  ;;  %v3329_v32 = vld [vmem:[%s4329_s5 + $0x358] sm:$0xff]  ;;  %v3328_v33 = vld [vmem:[%s4329_s5 + $0x350] sm:$0xff] }
 0x225   : > { %v1294_v34 = vpop.f32.mrf.mxu3 }
 0x226   : > { %v1295_v35 = vadd.f32 %v1294_v34, %v3923_v38  ;;  %v3327_v34 = vld [vmem:[%s4329_s5 + $0x348] sm:$0xff] }
 0x228   : > { %v1300_v36 = vpack.c.bf16 %v1295_v35, %v1295_v35 }
 0x22a   : > { %v1305_v39 = vsel %vm751_vm4, %v1300_v36, 0  ;;  %v3326_v36 = vld [vmem:[%s4329_s5 + $0x340] sm:$0xff] }
 0x22b   : > { %1314 = vmatpush.bf16.msra.mxu0 %v1305_v39  ;;  %v3356_v39 = vld [vmem:[%s4329_s5 + $0x430] sm:$0xff] }
 0x22d   : > { %v1296_v45 = vpop.f32.mrf.mxu3 }
 0x22e   : > { %2803 = vmatmul.msk.bf16.vlgmr.msra.gmra.mxu0 %vm747_vm5, %v2802_v42  ;;  %v3354_v45 = vld [vmem:[%s4329_s5 + $0x420] sm:$0xff] }
 0x22f   : > { %1463 = vmatpush.bf16.msrb.mxu0 %v3317_v37  ;;  %v1459_v38 = vpop.f32.mrf.mxu2  ;;  %v3357_v37 = vld [vmem:[%s4329_s5 + $0x438] sm:$0xff] }
 0x233   : > { %1464 = vmatpush.bf16.msrb.mxu0 %v3316_v43  ;;  %v3355_v43 = vld [vmem:[%s4329_s5 + $0x428] sm:$0xff] }
 0x237   : > { %1465 = vmatpush.bf16.msrb.mxu0 %v3315_v46  ;;  %v1461_v47 = vpop.f32.mrf.mxu2  ;;  %v3352_v46 = vld [vmem:[%s4329_s5 + $0x410] sm:$0xff] }
 0x238   : > { %v3350_v47 = vld [vmem:[%s4329_s5 + $0x400] sm:$0xff] }
 0x23b   : > { %1466 = vmatpush.bf16.msrb.mxu0 %v3314_v50  ;;  %v3351_v50 = vld [vmem:[%s4329_s5 + $0x408] sm:$0xff] }
 0x23f   : > { %1467 = vmatpush.bf16.msrb.mxu0 %v3313_v41 }
 0x243   : > { %1468 = vmatpush.bf16.msrb.mxu0 %v3312_v51 }
 0x245   : > { %v4076_v55 = vpop.f32.mrf.mxu3 }
 0x247   : > { %1469 = vmatpush.bf16.msrb.mxu0 %v3311_v53 }
 0x24b   : > { %1470 = vmatpush.bf16.msrb.mxu0 %v3310_v3  ;;  %v3344_v3 = vld [vmem:[%s4329_s5 + $0x3d0] sm:$0xff] }
 0x24d   : > { %v1639_v9 = vpop.f32.mrf.mxu3 }
 0x24e   : > { %1471 = vmatmul.bf16.vlgmr.msrb.gmra.mxu0 %v3826_v58  ;;  %v3342_v9 = vld [vmem:[%s4329_s5 + $0x3c0] sm:$0xff] }
 0x24f   : > { %1806 = vmatpush.bf16.msra.mxu0 %v3341_v5  ;;  %v3343_v5 = vld [vmem:[%s4329_s5 + $0x3c8] sm:$0xff] }
 0x253   : > { %1807 = vmatpush.bf16.msra.mxu0 %v3340_v8 }
 0x257   : > { %1808 = vmatpush.bf16.msra.mxu0 %v3339_v10 }
 0x25b   : > { %1809 = vmatpush.bf16.msra.mxu0 %v3338_v11 }
 0x25f   : > { %1810 = vmatpush.bf16.msra.mxu0 %v3337_v12 }
 0x263   : > { %1811 = vmatpush.bf16.msra.mxu0 %v3336_v13 }
 0x267   : > { %1812 = vmatpush.bf16.msra.mxu0 %v3335_v14 }
 0x26b   : > { %1813 = vmatpush.bf16.msra.mxu0 %v3334_v15 }
 0x26e   : > { %1814 = vmatmul.bf16.vlgmr.msra.gmra.mxu0 %v3819_v56 }
 0x295   : > { %v1138_v16 = vpop.f32.mrf.mxu0 }
 0x296   : > { %v1142_v17 = vadd.f32 %v1138_v16, %v964_v24  ;;  %v3332_v24 = vld [vmem:[%s4329_s5 + $0x370] sm:$0xff] }
 0x29d   : > { %v1140_v18 = vpop.f32.mrf.mxu0 }
 0x2ab   : > { %v1316_v19 = vpop.f32.mrf.mxu0 }
 0x2ac   : > { %v1320_v20 = vadd.f32 %v1316_v19, %v1142_v17  ;;  %v3365_v17 = vld [vmem:[%s4329_s5 + $0x478] sm:$0xff] }
 0x2ad   : > { %v3096_v19 = vld [vmem:[%s4327_s3 + $0x1c] sm:$0xf] }
 0x2b3   : > { %v1318_v21 = vpop.f32.mrf.mxu0 }
 0x2cb   : > { %v1472_v22 = vpop.f32.mrf.mxu0 }
 0x2cc   : > { %v1473_v23 = vadd.f32 %v1472_v22, %v1459_v38  ;;  %v3353_v38 = vld [vmem:[%s4329_s5 + $0x418] sm:$0xff]  ;;  %v3363_v22 = vld [vmem:[%s4329_s5 + $0x468] sm:$0xff] }
 0x2ce   : > { %v1478_v25 = vpack.c.bf16 %v1473_v23, %v1473_v23  ;;  %v3362_v23 = vld [vmem:[%s4329_s5 + $0x460] sm:$0xff] }
 0x2d0   : > { %v1483_v27 = vsel %vm751_vm4, %v1478_v25, 0  ;;  %v3361_v25 = vld [vmem:[%s4329_s5 + $0x458] sm:$0xff] }
 0x2d1   : > { %1492 = vmatpush.bf16.msra.mxu1 %v1483_v27  ;;  %v3359_v27 = vld [vmem:[%s4329_s5 + $0x448] sm:$0xff] }
 0x2d3   : > { %v1474_v29 = vpop.f32.mrf.mxu0 }
 0x2d4   : > { %2901 = vmatmul.msk.bf16.vlgmr.msra.gmra.mxu1 %vm747_vm5, %v2900_v28  ;;  %v3358_v28 = vld [vmem:[%s4329_s5 + $0x440] sm:$0xff] }
 0x2d5   : > { %1641 = vmatpush.bf16.msrb.mxu1 %v3333_v26  ;;  %v3360_v26 = vld [vmem:[%s4329_s5 + $0x450] sm:$0xff] }
 0x2d9   : > { %1642 = vmatpush.bf16.msrb.mxu1 %v3332_v24 }
 0x2dd   : > { %1643 = vmatpush.bf16.msrb.mxu1 %v3331_v30 }
 0x2e1   : > { %1644 = vmatpush.bf16.msrb.mxu1 %v3330_v31 }
 0x2e5   : > { %1645 = vmatpush.bf16.msrb.mxu1 %v3329_v32 }
 0x2e9   : > { %1646 = vmatpush.bf16.msrb.mxu1 %v3328_v33 }
 0x2eb   : > { %v4133_v35 = vpop.f32.mrf.mxu0 }
 0x2ed   : > { %1647 = vmatpush.bf16.msrb.mxu1 %v3327_v34 }
 0x2f1   : > { %1648 = vmatpush.bf16.msrb.mxu1 %v3326_v36 }
 0x2f3   : > { %v1817_v42 = vpop.f32.mrf.mxu0 }
 0x2f4   : > { %1649 = vmatmul.bf16.vlgmr.msrb.gmra.mxu1 %v3826_v58 }
 0x2f5   : > { %1984 = vmatpush.bf16.msra.mxu1 %v3357_v37  ;;  %v2037_v37 = vpop.permute.xlu0 %2036 }
 0x2f9   : > { %1985 = vmatpush.bf16.msra.mxu1 %v3356_v39 }
 0x2fd   : > { %1986 = vmatpush.bf16.msra.mxu1 %v3355_v43 }
 0x301   : > { %1987 = vmatpush.bf16.msra.mxu1 %v3354_v45 }
 0x305   : > { %1988 = vmatpush.bf16.msra.mxu1 %v3353_v38 }
 0x309   : > { %1989 = vmatpush.bf16.msra.mxu1 %v3352_v46 }
 0x30d   : > { %1990 = vmatpush.bf16.msra.mxu1 %v3351_v50 }
 0x311   : > { %1991 = vmatpush.bf16.msra.mxu1 %v3350_v47 }
 0x314   : > { %1992 = vmatmul.bf16.vlgmr.msra.gmra.mxu1 %v3819_v56 }
 0x315   : > { %2145 = vmatpush.bf16.msrb.mxu1 %v3937_v44 }
 0x319   : > { %2146 = vmatpush.bf16.msrb.mxu1 %v3946_v49 }
 0x31d   : > { %2147 = vmatpush.bf16.msrb.mxu1 %v3956_v40  ;;  %v3349_v40 = vld [vmem:[%s4329_s5 + $0x3f8] sm:$0xff] }
 0x321   : > { %2148 = vmatpush.bf16.msrb.mxu1 %v3968_v48 }
 0x325   : > { %2149 = vmatpush.bf16.msrb.mxu1 %v3978_v52  ;;  %v2998_v52 = vld [vmem:[%s4327_s3 + $0x18] sm:$0xf] }
 0x329   : > { %2150 = vmatpush.bf16.msrb.mxu1 %v3987_v54 }
 0x32d   : > { %2151 = vmatpush.bf16.msrb.mxu1 %v3996_v2  ;;  %v3347_v2 = vld [vmem:[%s4329_s5 + $0x3e8] sm:$0xff] }
 0x331   : > { %2152 = vmatpush.bf16.msrb.mxu1 %v4005_v4  ;;  %v3346_v4 = vld [vmem:[%s4329_s5 + $0x3e0] sm:$0xff] }
 0x334   : > { %2153 = vmatmul.bf16.vlgmr.msrb.gmra.mxu1 %v3650_v7  ;;  %v3348_v7 = vld [vmem:[%s4329_s5 + $0x3f0] sm:$0xff] }
 0x351   : > { %v1494_v41 = vpop.f32.mrf.mxu1 }
 0x352   : > { %v1498_v44 = vadd.f32 %v1494_v41, %v1320_v20  ;;  %v3364_v20 = vld [vmem:[%s4329_s5 + $0x470] sm:$0xff] }
 0x359   : > { %v1496_v51 = vpop.f32.mrf.mxu1 }
 0x371   : > { %v1650_v56 = vpop.f32.mrf.mxu1 }
 0x372   : > { %v1651_v49 = vadd.f32 %v1650_v56, %v4076_v55  ;;  %v3345_v55 = vld [vmem:[%s4329_s5 + $0x3d8] sm:$0xff] }
 0x374   : > { %v1656_v53 = vpack.c.bf16 %v1651_v49, %v1651_v49 }
 0x376   : > { %v1661_v48 = vsel %vm751_vm4, %v1656_v53, 0 }
 0x377   : > { %1670 = vmatpush.bf16.msrb.mxu2 %v1661_v48 }
 0x379   : > { %v1652_v54 = vpop.f32.mrf.mxu1 }
 0x37a   : > { %2999 = vmatmul.msk.bf16.vlgmr.msrb.gmra.mxu2 %vm747_vm5, %v2998_v52  ;;  %v3368_v52 = vld [vmem:[%s4332_s8] sm:$0xff] }
 0x37b   : > { %1819 = vmatpush.bf16.msra.mxu2 %v3349_v40 }
 0x37f   : > { %1820 = vmatpush.bf16.msra.mxu2 %v3348_v7 }
 0x383   : > { %1821 = vmatpush.bf16.msra.mxu2 %v3347_v2 }
 0x387   : > { %1822 = vmatpush.bf16.msra.mxu2 %v3346_v4 }
 0x38b   : > { %1823 = vmatpush.bf16.msra.mxu2 %v3345_v55 }
 0x38f   : > { %1824 = vmatpush.bf16.msra.mxu2 %v3344_v3 }
 0x391   : > { %v1993_v8 = vpop.f32.mrf.mxu1 }
 0x393   : > { %1825 = vmatpush.bf16.msra.mxu2 %v3343_v5  ;;  %v2070_v5 = vld [vmem:[%s4331_s7] sm:$0xff] }
 0x394   : > { %2076 = vperm.xlu1 %3470, %v2070_v5  }
 0x397   : > { %1826 = vmatpush.bf16.msra.mxu2 %v3342_v9 }
 0x399   : > { %v1995_v10 = vpop.f32.mrf.mxu1 }
 0x39a   : > { %1827 = vmatmul.bf16.vlgmr.msra.gmra.mxu2 %v3826_v58 }
 0x3b1   : > { %v2154_v43 = vpop.f32.mrf.mxu1 }
 0x3fd   : > { %v1672_v11 = vpop.f32.mrf.mxu2 }
 0x3fe   : > { %v1676_v12 = vadd.f32 %v1672_v11, %v1498_v44 }
 0x405   : > { %v1674_v13 = vpop.f32.mrf.mxu2 }
 0x41d   : > { %v1828_v14 = vpop.f32.mrf.mxu2 }
 0x41e   : > { %v1829_v15 = vadd.f32 %v1828_v14, %v4133_v35  ;;  %v3194_v35 = vld [vmem:[%s4327_s3 + $0x20] sm:$0xf]  ;;  %v2071_v14 = vld [vmem:[%s4331_s7 + $0x8] sm:$0xff] }
 0x41f   : > { %2081 = vperm.xlu1 %3470, %v2071_v14  }
 0x420   : > { %v1834_v16 = vpack.c.bf16 %v1829_v15, %v1829_v15  ;;  %v2073_v15 = vld [vmem:[%s4331_s7 + $0x18] sm:$0xff] }
 0x422   : > { %v1839_v18 = vsel %vm751_vm4, %v1834_v16, 0 }
 0x423   : > { %1848 = vmatpush.bf16.msrb.mxu3 %v1839_v18 }
 0x425   : > { %v1830_v21 = vpop.f32.mrf.mxu2 }
 0x426   : > { %3097 = vmatmul.msk.bf16.vlgmr.msrb.gmra.mxu3 %vm747_vm5, %v3096_v19  ;;  %v3367_v21 = vld [vmem:[%s4330_s6 + $0x8] sm:$0xff] }
 0x427   : > { %1997 = vmatpush.bf16.msra.mxu3 %v3365_v17  ;;  %v3369_v17 = vld [vmem:[%s4332_s8 + $0x8] sm:$0xff] }
 0x42b   : > { %1998 = vmatpush.bf16.msra.mxu3 %v3364_v20  ;;  %v3366_v20 = vld [vmem:[%s4330_s6] sm:$0xff] }
 0x42f   : > { %1999 = vmatpush.bf16.msra.mxu3 %v3363_v22 }
 0x433   : > { %2000 = vmatpush.bf16.msra.mxu3 %v3362_v23 }
 0x437   : > { %2001 = vmatpush.bf16.msra.mxu3 %v3361_v25  ;;  %v2077_v25 = vpop.permute.xlu1 %2076 }
 0x43b   : > { %2002 = vmatpush.bf16.msra.mxu3 %v3360_v26 }
 0x43f   : > { %2003 = vmatpush.bf16.msra.mxu3 %v3359_v27 }
 0x443   : > { %2004 = vmatpush.bf16.msra.mxu3 %v3358_v28 }
 0x446   : > { %2005 = vmatmul.bf16.vlgmr.msra.gmra.mxu3 %v3826_v58 }
 0x491   : > { %v2082_v28 = vpop.permute.xlu1 %2081 }
 0x4a9   : > { %v1850_v24 = vpop.f32.mrf.mxu3 }
 0x4aa   : > { %v1854_v29 = vadd.f32 %v1850_v24, %v1676_v12 }
 0x4b1   : > { %v1852_v30 = vpop.f32.mrf.mxu3 }
 0x4c9   : > { %v2006_v31 = vpop.f32.mrf.mxu3 }
 0x4ca   : > { %v2007_v32 = vadd.f32 %v2006_v31, %v1993_v8  ;;  %v2072_v8 = vld [vmem:[%s4331_s7 + $0x10] sm:$0xff] }
 0x4cb   : > { %2086 = vperm.xlu2 %3471, %v2072_v8  }
 0x4cc   : > { %v2012_v33 = vpack.c.bf16 %v2007_v32, %v2007_v32 }
 0x4ce   : > { %v2017_v34 = vsel %vm751_vm4, %v2012_v33, 0 }
 0x4cf   : > { %2026 = vmatpush.bf16.msrb.mxu0 %v2017_v34 }
 0x4d1   : > { %v2008_v36 = vpop.f32.mrf.mxu3 }
 0x4d2   : > { %3195 = vmatmul.msk.bf16.vlgmr.msrb.gmra.mxu0 %vm747_vm5, %v3194_v35 }
 0x4d3   : > { %2132 = vmatpush.bf16.msra.mxu0 %v3824_v57  ;;  %2091 = vperm.xlu2 %3471, %v2073_v15  }
 0x4d7   : > { %2133 = vmatpush.bf16.msra.mxu0 %v3836_v59 }
 0x4db   : > { %2134 = vmatpush.bf16.msra.mxu0 %v3842_v60 }
 0x4df   : > { %2135 = vmatpush.bf16.msra.mxu0 %v3848_v61 }
 0x4e3   : > { %2136 = vmatpush.bf16.msra.mxu0 %v3854_v62 }
 0x4e7   : > { %2137 = vmatpush.bf16.msra.mxu0 %v3862_v63 }
 0x4eb   : > { %2138 = vmatpush.bf16.msra.mxu0 %v3868_v0  ;;  %v2156_v0 = vpop.f32.mrf.mxu1 }
 0x4ef   : > { %2139 = vmatpush.bf16.msra.mxu0 %v3874_v1 }
 0x4f2   : > { %2140 = vmatmul.bf16.vlgmr.msra.gmra.mxu0 %v3648_v6 }
 0x525   : > { %v2087_v24 = vpop.permute.xlu2 %2086 }
 0x54f   : > { %v2028_v57 = vpop.f32.mrf.mxu0 }
 0x550   : > { %v2032_v58 = vadd.f32 %v2028_v57, %v1854_v29 }
 0x552   : > { %v2039_v39 = vadd.f32 %v2037_v37, %v2032_v58  ;;  %v2092_v58 = vpop.permute.xlu2 %2091 }
 0x554   : > { %v2040_v42 = vmax.f32 %v2039_v39, 0.0 }
 0x556   : > { %v2041_v59 = vand.u32 2147483647, %v2040_v42 }
 0x557   : > { %v2030_v60 = vpop.f32.mrf.mxu0 }
 0x558   : > { %v2043_v61 = vsel %vm2042_vm6, %v2041_v59, -inf }
 0x559   : > { %v2044_v62 = vrot.slane %v2043_v61, 4 }
 0x55b   : > { %v2045_v45 = vmax.f32 %v2043_v61, %v2044_v62 }
 0x55d   : > { %v2046_v63 = vrot.slane %v2045_v45, 2 }
 0x55f   : > { %v2047_v38 = vmax.f32 %v2045_v45, %v2046_v63 }
 0x561   : > { %v2048_v46 = vrot.slane %v2047_v38, 1 }
 0x563   : > { %v2049_v1 = vmax.f32 %v2047_v38, %v2048_v46 }
 0x565   : > { %v2050_v50 = vmax.f32 %v2049_v1, 1e-30 }
 0x567   : > { %v2052_v6 = vshra.s32 %v2050_v50, 23 }
 0x569   : > { %v2053_v47 = vand.u32 255, %v2052_v6 }
 0x56b   : > { %v2054_v41 = vadd.s32 4294967294, %v2053_v47 }
 0x56d   : > { %v2057_v51 = vsub.s32 254, %v2054_v41  ;;  %v2055_v12 = vshll.u32 %v2054_v41, 23 }
 0x56f   : > { %v2141_v44 = vpop.f32.mrf.mxu0  ;;  %v2058_v49 = vshll.u32 %v2057_v51, 23 }
 0x570   : > { %v2155_v56 = vadd.f32 %v2154_v43, %v2141_v44 }
 0x571   : > { %v2060_v40 = vmul.f32 %v2058_v49, %v2040_v42 }
 0x572   : > { %v2162_v53 = vpack.c.bf16 %v2155_v56, %v2155_v56 }
 0x573   : > { %v3389_v7 = vcvt.f32.s32 %v2060_v40  ;;  %v3387_v4 = vand.u32 2147483647, %v2060_v40  ;;  %v3392_v3 = vand.u32 2147483648, %v2060_v40 }
 0x574   : > { %v2180_v48 = vsel %vm352_vm0, %v2162_v53, 0 }
 0x575   : > { %2189 = vmatpush.bf16.msrb.mxu3 %v2180_v48  ;;  %v3390_v2 = vcvt.s32.f32 %v3389_v7  ;;  %vm3388_vm7 = vcmp.lt.f32.partialorder %v3387_v4, 8388608.0 }
 0x577   : > { %v2143_v54 = vpop.f32.mrf.mxu0  ;;  %v3391_v55 = vand.u32 2147483647, %v3390_v2 }
 0x578   : > { %3214 = vmatmul.msk.bf16.vlgmr.msrb.gmra.mxu3 %vm348_vm1, %v3368_v52 }
 0x579   : > { %v3393_v9 = vor.u32 %v3392_v3, %v3391_v55 }
 0x57b   : > { %v3394_v10 = vsel %vm3388_vm7, %v3393_v9, %v2060_v40 }
 0x57c   : > { %v2062_v11 = vmax.f32 %v3394_v10, -8.0 }
 0x57e   : > { %v2063_v13 = vmin.f32 %v2062_v11, 7.0 }
 0x580   : > { %v2064_v16 = vmul.f32 %v2063_v13, %v2055_v12 }
 0x582   : > { %v2065_v18 = vpack.c.bf16 %v2064_v16, %v2064_v16 }
 0x584   : > { %v2111_v19 = vsel %vm751_vm4, %v2065_v18, 0 }
 0x585   : > { %2120 = vmatpush.bf16.msrb.mxu2 %v2111_v19 }
 0x588   : > { %3215 = vmatmul.msk.bf16.gmra.mxu3 %vm348_vm1, %v3369_v17  ;;  %3204 = vmatmul.msk.bf16.vlgmr.msrb.gmra.mxu2 %vm747_vm5, %v3366_v20 }
 0x598   : > { %3205 = vmatmul.msk.bf16.gmra.mxu2 %vm747_vm5, %v3367_v21 }
 0x5fb   : > { %v2191_v22 = vpop.f32.mrf.mxu3 }
 0x603   : > { %v2193_v26 = vpop.f32.mrf.mxu3 }
 0x60b   : > { %v2122_v23 = vpop.f32.mrf.mxu2  ;;  %v2196_v31 = vpop.f32.mrf.mxu3 }
 0x60c   : > { %v2123_v32 = vadd.f32 %v2122_v23, %v2077_v25 }
 0x60e   : > { %v2201_v35 = vadd.f32 %v2191_v22, %v2123_v32 }
 0x610   : > { %v2205_v39 = vmax.f32 %v2201_v35, 0.0 }
 0x612   : > { %v2209_v62 = vand.u32 2147483647, %v2205_v39 }
 0x613   : > { %v2124_v27 = vpop.f32.mrf.mxu2  ;;  %v2198_v60 = vpop.f32.mrf.mxu3 }
 0x614   : > { %v2125_v29 = vadd.f32 %v2124_v27, %v2082_v28  ;;  %v2213_v46 = vsel %vm2042_vm6, %v2209_v62, -inf }
 0x616   : > { %v2202_v34 = vadd.f32 %v2193_v26, %v2125_v29 }
 0x618   : > { %v2206_v57 = vmax.f32 %v2202_v34, 0.0 }
 0x61a   : > { %v2210_v43 = vand.u32 2147483647, %v2206_v57 }
 0x61b   : > { %v2127_v30 = vpop.f32.mrf.mxu2 }
 0x61c   : > { %v2128_v33 = vadd.f32 %v2127_v30, %v2087_v24  ;;  %v2214_v38 = vsel %vm2042_vm6, %v2210_v43, -inf }
 0x61d   : > { %v2217_v6 = vmax.f32 %v2213_v46, %v2214_v38 }
 0x61e   : > { %v2203_v36 = vadd.f32 %v2196_v31, %v2128_v33 }
 0x620   : > { %v2207_v42 = vmax.f32 %v2203_v36, 0.0 }
 0x622   : > { %v2211_v45 = vand.u32 2147483647, %v2207_v42 }
 0x623   : > { %v2129_v37 = vpop.f32.mrf.mxu2 }
 0x624   : > { %v2130_v59 = vadd.f32 %v2129_v37, %v2092_v58  ;;  %v2215_v1 = vsel %vm2042_vm6, %v2211_v45, -inf }
 0x626   : > { %v2204_v61 = vadd.f32 %v2198_v60, %v2130_v59 }
 0x628   : > { %v2208_v63 = vmax.f32 %v2204_v61, 0.0 }
 0x62a   : > { %v2212_v0 = vand.u32 2147483647, %v2208_v63 }
 0x62c   : > { %v2216_v50 = vsel %vm2042_vm6, %v2212_v0, -inf }
 0x62d   : > { %v2218_v47 = vmax.f32 %v2215_v1, %v2216_v50 }
 0x62f   : > { %v2219_v41 = vmax.f32 %v2217_v6, %v2218_v47 }
 0x631   : > { %v2220_v44 = vrot.slane %v2219_v41, 4 }
 0x633   : > { %v2221_v51 = vmax.f32 %v2219_v41, %v2220_v44 }
 0x635   : > { %v2222_v56 = vrot.slane %v2221_v51, 2 }
 0x637   : > { %v2223_v49 = vmax.f32 %v2221_v51, %v2222_v56 }
 0x639   : > { %v2224_v53 = vrot.slane %v2223_v49, 1 }
 0x63b   : > { %v2225_v40 = vmax.f32 %v2223_v49, %v2224_v53 }
 0x63d   : > { %v2226_v48 = vmax.f32 %v2225_v40, 1e-30 }
 0x63f   : > { %v2228_v52 = vshra.s32 %v2226_v48, 23 }
 0x641   : > { %v2229_v7 = vand.u32 255, %v2228_v52 }
 0x643   : > { %v2230_v54 = vadd.s32 4294967294, %v2229_v7 }
 0x645   : > { %v2233_v2 = vsub.s32 254, %v2230_v54  ;;  %v2231_v37 = vshll.u32 %v2230_v54, 23 }
 0x647   : > { %v2234_v4 = vshll.u32 %v2233_v2, 23 }
 0x649   : > { %v2236_v55 = vmul.f32 %v2234_v4, %v2205_v39  ;;  %v2237_v3 = vmul.f32 %v2234_v4, %v2206_v57  ;;  %v2238_v5 = vmul.f32 %v2234_v4, %v2207_v42  ;;  %v2239_v8 = vmul.f32 %v2234_v4, %v2208_v63 }
 0x64b   : > { %v3397_v9 = vcvt.f32.s32 %v2236_v55  ;;  %v3405_v10 = vcvt.f32.s32 %v2237_v3  ;;  %v3413_v11 = vcvt.f32.s32 %v2238_v5  ;;  %v3395_v12 = vand.u32 2147483647, %v2236_v55 }
 0x64c   : > { %v3403_v14 = vand.u32 2147483647, %v2237_v3  ;;  %v3400_v18 = vand.u32 2147483648, %v2236_v55  ;;  %v3411_v19 = vand.u32 2147483647, %v2238_v5  ;;  %v3421_v20 = vcvt.f32.s32 %v2239_v8 }
 0x64d   : > { %v3398_v13 = vcvt.s32.f32 %v3397_v9  ;;  %v3406_v15 = vcvt.s32.f32 %v3405_v10  ;;  %v3414_v16 = vcvt.s32.f32 %v3413_v11  ;;  %v3408_v22 = vand.u32 2147483648, %v2237_v3 }
 0x64e   : > { %v3416_v25 = vand.u32 2147483648, %v2238_v5  ;;  %vm3396_vm8 = vcmp.lt.f32.partialorder %v3395_v12, 8388608.0  ;;  %v3422_v27 = vcvt.s32.f32 %v3421_v20  ;;  %vm3404_vm9 = vcmp.lt.f32.partialorder %v3403_v14, 8388608.0 }
 0x64f   : > { %v3399_v17 = vand.u32 2147483647, %v3398_v13  ;;  %v3407_v21 = vand.u32 2147483647, %v3406_v15  ;;  %v3415_v23 = vand.u32 2147483647, %v3414_v16 }
 0x650   : > { %v3419_v29 = vand.u32 2147483647, %v2239_v8  ;;  %vm3412_vm10 = vcmp.lt.f32.partialorder %v3411_v19, 8388608.0  ;;  %v3423_v31 = vand.u32 2147483647, %v3422_v27  ;;  %v3424_v32 = vand.u32 2147483648, %v2239_v8 }
 0x651   : > { %v3401_v26 = vor.u32 %v3400_v18, %v3399_v17  ;;  %v3409_v28 = vor.u32 %v3408_v22, %v3407_v21  ;;  %v3417_v24 = vor.u32 %v3416_v25, %v3415_v23 }
 0x652   : > { %v3425_v36 = vor.u32 %v3424_v32, %v3423_v31  ;;  %vm3420_vm11 = vcmp.lt.f32.partialorder %v3419_v29, 8388608.0 }
 0x653   : > { %v3402_v30 = vsel %vm3396_vm8, %v3401_v26, %v2236_v55  ;;  %v3410_v33 = vsel %vm3404_vm9, %v3409_v28, %v2237_v3  ;;  %v3418_v34 = vsel %vm3412_vm10, %v3417_v24, %v2238_v5 }
 0x654   : > { %v2244_v35 = vmax.f32 %v3402_v30, -8.0  ;;  %v2245_v57 = vmax.f32 %v3410_v33, -8.0  ;;  %v2246_v58 = vmax.f32 %v3418_v34, -8.0  ;;  %v3426_v42 = vsel %vm3420_vm11, %v3425_v36, %v2239_v8 }
 0x655   : > { %v2247_v43 = vmax.f32 %v3426_v42, -8.0 }
 0x656   : > { %v2248_v39 = vmin.f32 %v2244_v35, 7.0  ;;  %v2249_v59 = vmin.f32 %v2245_v57, 7.0  ;;  %v2250_v60 = vmin.f32 %v2246_v58, 7.0 }
 0x657   : > { %v2251_v63 = vmin.f32 %v2247_v43, 7.0 }
 0x658   : > { %v2252_v61 = vmul.f32 %v2248_v39, %v2231_v37  ;;  %v2253_v62 = vmul.f32 %v2249_v59, %v2231_v37  ;;  %v2254_v45 = vmul.f32 %v2250_v60, %v2231_v37 }
 0x659   : > { %v2255_v38 = vmul.f32 %v2251_v63, %v2231_v37 }
 0x65a   : > { %2256 = vst.msk [vmem:[%s325_s13] sm:$0xff] %vm2042_vm6, %v2252_v61 }
 0x65b   : > { %2257 = vst.msk [vmem:[%s325_s13 + $0x8] sm:$0xff] %vm2042_vm6, %v2253_v62 }
 0x65c   : > { %2258 = vst.msk [vmem:[%s325_s13 + $0x10] sm:$0xff] %vm2042_vm6, %v2254_v45 }
 0x65d   : > { %2259 = vst.msk [vmem:[%s325_s13 + $0x18] sm:$0xff] %vm2042_vm6, %v2255_v38 }
 0x65e   : > { %3499 = shalt.err (!%p3496_p3)
}
 0x65f   : > { %s3537_s14 = smov 128   ;;  %s3538_s23 = smov 8  }
 0x660   : > { %3427 = dma.vmem_to_hbm [thread:$0]  (%p3627_p5), %s2274_s24, 512, %s2276_s25, %s2261_s26, %s3537_s14, %s3537_s14, %s3538_s23  }
 0x661 PF: > { %p3433_p4 = scmp.ge.s32.totalorder %s3534_s12, 2  ;;  %s2290_s13 = sand.u32 1, %s3522_s30  }
 0x662   : > { %s2291_s29 = scalar_lea.sflag [#allocation3], %s2290_s13 }
 0x663   : > { %p3430_p7 = pnand %p3433_p4, %p3631_p6 }
 0x665   : > { %p3431_p8 = pneg %p3430_p7 }
 0x667   : > { %3517 = dma.done.wait (%p3431_p8), %s2291_s29, 512  }
 0x668   : > { %3519 = vsyncadd (%p3431_p8), %s2291_s29, 4294966784  ;;  %p19_p9 = scmp.ge.s32.totalorder %s3614_s15, 4   ;;  %s4336_s30 = smov %s3526_s10 }
 0x669   : > { %s4337_s10 = smov %s3530_s11  ;;  %s4338_s11 = smov %s3625_s18 }
 0x66a   : > { %s4339_s12 = smov %s3614_s15  ;;  %21 = sbr.rel (!%p19_p9) target bundleno = 3 (0x3), region = 107 }
 0x66f   :  { %2297 = vsyncpa [#allocation3], 1 }
 0x670   :  { %2299 = vsyncpa [#allocation3 + $0x1], 1 }

</bundles_post_ra>
